<compile_context>
chip_gen: v7x
topology: tpu7x:2x2x1
jax: 0.10.0
libtpu: 0.0.40
codegen_flags: <defaults>
</compile_context>

<pallas_src>
import functools

import jax
import jax.numpy as jnp
from jax.experimental import pallas as pl
from jax.experimental.pallas import tpu as pltpu


W_PAD = 128  # MXU-friendly width for the final (emb_dim, 1) weight (output NOT padded)


def _round_up(x, m):
    return ((x + m - 1) // m) * m


def _choose_tm(batch):
    """Padding-aware batch tile: big tiles to amortize per-step overhead, >=2 grid
    steps when possible (v7x megacore), minimal dead padded rows."""
    if batch <= 256:
        return _round_up(batch, 8)
    best = None
    for tm in (1024, 512, 256, 128):
        bp = _round_up(batch, tm)
        steps = bp // tm
        if steps < 2:                       # keep both v7x TensorCores fed
            continue
        waste = bp - batch                  # dead rows that still run every matmul
        cost = waste + steps * 16           # small penalty per grid step
        if best is None or cost < best[1]:
            best = (tm, cost)
    return best[0] if best is not None else 256


def _vmem_budget_bytes():
    """Physical VMEM minus headroom for Mosaic internal scratch / semaphores."""
    cap = 64 * 1024 * 1024                  # conservative default (v7x per-TC)
    try:
        info = pltpu.get_tpu_info()
        cap = int(getattr(info, "vmem_capacity_bytes", cap))
    except Exception:
        pass
    return max(cap - 8 * 1024 * 1024, 24 * 1024 * 1024)


def _resident_spec(shape):
    """Constant-block-index spec (weight stays VMEM-resident); single-buffered."""
    if hasattr(pl, "Buffered"):
        return pl.BlockSpec(shape, lambda i: (0, 0), pipeline_mode=pl.Buffered(1))
    return pl.BlockSpec(shape, lambda i: (0, 0))


def _make_mlp_kernel(num_layers, relu_flags):
    """Kernel refs = (x, w0, b0, w1, b1, ..., out). Fully unrolled layer chain."""

    def kernel(*refs):
        x_ref = refs[0]
        o_ref = refs[-1]
        h = x_ref[...].astype(jnp.bfloat16)     # in-kernel f32 -> bf16 (VPU, hidden)
        for li in range(num_layers):
            w = refs[1 + 2 * li][...]           # bf16 (in, out) -> bf16 MXU path
            b = refs[2 + 2 * li][...]           # f32  (1, out)
            acc = jnp.dot(h, w, preferred_element_type=jnp.float32) + b
            if relu_flags[li]:
                acc = jnp.maximum(acc, 0.0)
            if li < num_layers - 1:
                h = acc.astype(jnp.bfloat16)    # keep MXU inputs bf16
            else:
                h = acc                         # final layer stays f32
        # Store only the true output columns (1) -> narrow, unpadded HBM writeback.
        o_ref[...] = h[:, : o_ref.shape[-1]].astype(o_ref.dtype)

    return kernel


def init_params(key, context_size, emb_dim=512, deepth=3):
    """PyTorch-style Linear init (uniform +-1/sqrt(fan_in)); bf16 weights, f32 biases."""
    dims = []
    for i in range(deepth):                      # encoders: Linear + ReLU
        dims.append((context_size if i == 0 else emb_dim, emb_dim, True))
    for i in range(deepth):                      # decoders
        if i == deepth - 1:
            dims.append((emb_dim, 1, False))     # final Linear, no activation
        else:
            dims.append((emb_dim, emb_dim, True))

    params, relu_flags = [], []
    for (fan_in, fan_out, has_relu) in dims:
        key, kw, kb = jax.random.split(key, 3)
        bound = 1.0 / (fan_in ** 0.5)
        w = jax.random.uniform(kw, (fan_in, fan_out), jnp.float32, -bound, bound)
        b = jax.random.uniform(kb, (1, fan_out), jnp.float32, -bound, bound)
        params.append((w.astype(jnp.bfloat16), b))
        relu_flags.append(has_relu)
    return params, tuple(relu_flags)


@functools.partial(jax.jit, static_argnames=("relu_flags",))
def mlp_forward(x, params_flat, relu_flags):
    num_layers = len(params_flat) // 2
    batch, ctx = x.shape

    weights = list(params_flat[0::2])
    biases = list(params_flat[1::2])
    out_dim = weights[-1].shape[1]               # 1 in the reference module

    # Pad only the final WEIGHT/BIAS to an MXU-friendly width; the output array
    # itself stays (batch, out_dim) -> no wide HBM writeback, no post-kernel slice.
    if out_dim < W_PAD:
        weights[-1] = jnp.pad(weights[-1], ((0, 0), (0, W_PAD - out_dim)))
        biases[-1] = jnp.pad(biases[-1], ((0, 0), (0, W_PAD - out_dim)))

    tm = _choose_tm(batch)
    batch_pad = _round_up(batch, tm)

    x_in = x
    if batch_pad != batch:                       # pad only the ragged tail
        x_in = jnp.pad(x, ((0, batch_pad - batch), (0, 0)))

    grid = (batch_pad // tm,)

    in_specs = [pl.BlockSpec((tm, ctx), lambda i: (i, 0))]
    flat_params = []
    for w, b in zip(weights, biases):
        in_specs.append(_resident_spec(w.shape))  # single-buffered, VMEM-resident
        in_specs.append(_resident_spec(b.shape))
        flat_params += [w, b]
    out_spec = pl.BlockSpec((tm, out_dim), lambda i: (i, 0))

    # VMEM budget: single-buffered weights + double-buffered x/out tiles +
    # live activation headroom, capped below the physical ceiling with headroom.
    weight_bytes = sum(int(w.size) * w.dtype.itemsize + int(b.size) * b.dtype.itemsize
                       for w, b in zip(weights, biases))
    max_feat = max(int(w.shape[1]) for w in weights)
    io_bytes = 2 * tm * ctx * 4 + 2 * tm * out_dim * 4
    act_bytes = 3 * tm * max_feat * 4
    need = weight_bytes + io_bytes + act_bytes + (4 << 20)
    vmem_limit = int(min(max(32 << 20, need), _vmem_budget_bytes()))

    kernel = _make_mlp_kernel(num_layers, relu_flags)
    out = pl.pallas_call(
        kernel,
        out_shape=jax.ShapeDtypeStruct((batch_pad, out_dim), jnp.float32),
        grid_spec=pltpu.PrefetchScalarGridSpec(
            num_scalar_prefetch=0,
            grid=grid,
            in_specs=in_specs,
            out_specs=out_spec,
        ),
        compiler_params=pltpu.CompilerParams(
            dimension_semantics=("parallel",),
            vmem_limit_bytes=vmem_limit,
        ),
    )(x_in, *flat_params)

    return out[:batch]                            # drop padded (garbage) tail rows


def reference_forward(x, params, relu_flags):
    """Plain-JAX reference that mirrors the kernel's dtype path (bf16 MXU, f32 acc).
    Note: bf16 weights/activations differ from the f32 PyTorch model at ~1e-2 level."""
    h = x.astype(jnp.bfloat16)
    out = None
    n = len(params)
    for idx, ((w, b), act) in enumerate(zip(params, relu_flags)):
        acc = jnp.dot(h, w, preferred_element_type=jnp.float32) + b
        if act:
            acc = jnp.maximum(acc, 0.0)
        if idx < n - 1:
            h = acc.astype(jnp.bfloat16)
        else:
            out = acc
    return out


if __name__ == "__main__":
    # Small shapes consistent with myModel(contextSize, emb_dim, deepth),
    # input (batch, contextSize). batch chosen to exercise >1 grid step.
    batch = 512
    context_size = 32
    emb_dim = 128
    deepth = 3

    key = jax.random.PRNGKey(0)
    key, kx = jax.random.split(key)
    x = jax.random.normal(kx, (batch, context_size), dtype=jnp.float32)

    params, relu_flags = init_params(key, context_size, emb_dim, deepth)
    params_flat = tuple(p for wb in params for p in wb)

    out = mlp_forward(x, params_flat, relu_flags)
    out = jax.block_until_ready(out)

    ref = reference_forward(x, params, relu_flags)
    assert out.shape == (batch, 1), out.shape
    assert jnp.allclose(out, ref, atol=1e-2, rtol=1e-2), (
        "mismatch vs reference, max abs err = "
        + str(float(jnp.max(jnp.abs(out - ref)))))

    print("KERNEL_OK")
</pallas_src>

<mosaic_0001>
module attributes {stable_mosaic.version = 11 : i64} {
  func.func @kernel(%arg0: i32, %arg1: memref<256x32xf32, #tpu.memory_space<vmem>>, %arg2: memref<32x128xbf16, #tpu.memory_space<vmem>>, %arg3: memref<1x128xf32, #tpu.memory_space<vmem>>, %arg4: memref<128x128xbf16, #tpu.memory_space<vmem>>, %arg5: memref<1x128xf32, #tpu.memory_space<vmem>>, %arg6: memref<128x128xbf16, #tpu.memory_space<vmem>>, %arg7: memref<1x128xf32, #tpu.memory_space<vmem>>, %arg8: memref<128x128xbf16, #tpu.memory_space<vmem>>, %arg9: memref<1x128xf32, #tpu.memory_space<vmem>>, %arg10: memref<128x128xbf16, #tpu.memory_space<vmem>>, %arg11: memref<1x128xf32, #tpu.memory_space<vmem>>, %arg12: memref<128x128xbf16, #tpu.memory_space<vmem>>, %arg13: memref<1x128xf32, #tpu.memory_space<vmem>>, %arg14: memref<256x1xf32, #tpu.memory_space<vmem>>) attributes {dimension_semantics = [#tpu.dimension_semantics<parallel>], iteration_bounds = array<i64: 2>, scalar_prefetch = 0 : i64, scratch_operands = 0 : i64, tpu.core_type = #tpu.core_type<tc>, window_params = [{transform_indices = @transform_0, window_bounds = array<i64: 256, 32>}, {pipeline_mode = #tpu.pipeline_mode<synchronous>, transform_indices = @transform_1, window_bounds = array<i64: 32, 128>}, {pipeline_mode = #tpu.pipeline_mode<synchronous>, transform_indices = @transform_2, window_bounds = array<i64: 1, 128>}, {pipeline_mode = #tpu.pipeline_mode<synchronous>, transform_indices = @transform_3, window_bounds = array<i64: 128, 128>}, {pipeline_mode = #tpu.pipeline_mode<synchronous>, transform_indices = @transform_4, window_bounds = array<i64: 1, 128>}, {pipeline_mode = #tpu.pipeline_mode<synchronous>, transform_indices = @transform_5, window_bounds = array<i64: 128, 128>}, {pipeline_mode = #tpu.pipeline_mode<synchronous>, transform_indices = @transform_6, window_bounds = array<i64: 1, 128>}, {pipeline_mode = #tpu.pipeline_mode<synchronous>, transform_indices = @transform_7, window_bounds = array<i64: 128, 128>}, {pipeline_mode = #tpu.pipeline_mode<synchronous>, transform_indices = @transform_8, window_bounds = array<i64: 1, 128>}, {pipeline_mode = #tpu.pipeline_mode<synchronous>, transform_indices = @transform_9, window_bounds = array<i64: 128, 128>}, {pipeline_mode = #tpu.pipeline_mode<synchronous>, transform_indices = @transform_10, window_bounds = array<i64: 1, 128>}, {pipeline_mode = #tpu.pipeline_mode<synchronous>, transform_indices = @transform_11, window_bounds = array<i64: 128, 128>}, {pipeline_mode = #tpu.pipeline_mode<synchronous>, transform_indices = @transform_12, window_bounds = array<i64: 1, 128>}, {transform_indices = @transform_13, window_bounds = array<i64: 256, 1>}]} {
    %c0 = arith.constant 0 : index
    %c0_0 = arith.constant 0 : index
    %0 = vector.load %arg1[%c0, %c0_0] : memref<256x32xf32, #tpu.memory_space<vmem>>, vector<256x32xf32>
    %1 = arith.truncf %0 : vector<256x32xf32> to vector<256x32xbf16>
    %c0_1 = arith.constant 0 : index
    %c0_2 = arith.constant 0 : index
    %2 = vector.load %arg2[%c0_1, %c0_2] : memref<32x128xbf16, #tpu.memory_space<vmem>>, vector<32x128xbf16>
    %c0_3 = arith.constant 0 : index
    %c0_4 = arith.constant 0 : index
    %3 = vector.load %arg3[%c0_3, %c0_4] : memref<1x128xf32, #tpu.memory_space<vmem>>, vector<1x128xf32>
    %cst = arith.constant dense<0.000000e+00> : vector<256x128xf32>
    %4 = tpu.matmul %1, %2, %cst {dimension_numbers = #tpu.dot_dimension_numbers<[1], [0], [0], [1], [0, 0, 1, 1], [], []>} : vector<256x32xbf16>, vector<32x128xbf16>, vector<256x128xf32> -> vector<256x128xf32>
    %5 = vector.broadcast %3 : vector<1x128xf32> to vector<256x128xf32>
    %6 = arith.addf %4, %5 : vector<256x128xf32>
    %cst_5 = arith.constant 0.000000e+00 : f32
    %7 = vector.broadcast %cst_5 : f32 to vector<256x128xf32>
    %8 = arith.maximumf %6, %7 : vector<256x128xf32>
    %9 = arith.truncf %8 : vector<256x128xf32> to vector<256x128xbf16>
    %c0_6 = arith.constant 0 : index
    %c0_7 = arith.constant 0 : index
    %10 = vector.load %arg4[%c0_6, %c0_7] : memref<128x128xbf16, #tpu.memory_space<vmem>>, vector<128x128xbf16>
    %c0_8 = arith.constant 0 : index
    %c0_9 = arith.constant 0 : index
    %11 = vector.load %arg5[%c0_8, %c0_9] : memref<1x128xf32, #tpu.memory_space<vmem>>, vector<1x128xf32>
    %cst_10 = arith.constant dense<0.000000e+00> : vector<256x128xf32>
    %12 = tpu.matmul %9, %10, %cst_10 {dimension_numbers = #tpu.dot_dimension_numbers<[1], [0], [0], [1], [0, 0, 1, 1], [], []>} : vector<256x128xbf16>, vector<128x128xbf16>, vector<256x128xf32> -> vector<256x128xf32>
    %13 = vector.broadcast %11 : vector<1x128xf32> to vector<256x128xf32>
    %14 = arith.addf %12, %13 : vector<256x128xf32>
    %cst_11 = arith.constant 0.000000e+00 : f32
    %15 = vector.broadcast %cst_11 : f32 to vector<256x128xf32>
    %16 = arith.maximumf %14, %15 : vector<256x128xf32>
    %17 = arith.truncf %16 : vector<256x128xf32> to vector<256x128xbf16>
    %c0_12 = arith.constant 0 : index
    %c0_13 = arith.constant 0 : index
    %18 = vector.load %arg6[%c0_12, %c0_13] : memref<128x128xbf16, #tpu.memory_space<vmem>>, vector<128x128xbf16>
    %c0_14 = arith.constant 0 : index
    %c0_15 = arith.constant 0 : index
    %19 = vector.load %arg7[%c0_14, %c0_15] : memref<1x128xf32, #tpu.memory_space<vmem>>, vector<1x128xf32>
    %cst_16 = arith.constant dense<0.000000e+00> : vector<256x128xf32>
    %20 = tpu.matmul %17, %18, %cst_16 {dimension_numbers = #tpu.dot_dimension_numbers<[1], [0], [0], [1], [0, 0, 1, 1], [], []>} : vector<256x128xbf16>, vector<128x128xbf16>, vector<256x128xf32> -> vector<256x128xf32>
    %21 = vector.broadcast %19 : vector<1x128xf32> to vector<256x128xf32>
    %22 = arith.addf %20, %21 : vector<256x128xf32>
    %cst_17 = arith.constant 0.000000e+00 : f32
    %23 = vector.broadcast %cst_17 : f32 to vector<256x128xf32>
    %24 = arith.maximumf %22, %23 : vector<256x128xf32>
    %25 = arith.truncf %24 : vector<256x128xf32> to vector<256x128xbf16>
    %c0_18 = arith.constant 0 : index
    %c0_19 = arith.constant 0 : index
    %26 = vector.load %arg8[%c0_18, %c0_19] : memref<128x128xbf16, #tpu.memory_space<vmem>>, vector<128x128xbf16>
    %c0_20 = arith.constant 0 : index
    %c0_21 = arith.constant 0 : index
    %27 = vector.load %arg9[%c0_20, %c0_21] : memref<1x128xf32, #tpu.memory_space<vmem>>, vector<1x128xf32>
    %cst_22 = arith.constant dense<0.000000e+00> : vector<256x128xf32>
    %28 = tpu.matmul %25, %26, %cst_22 {dimension_numbers = #tpu.dot_dimension_numbers<[1], [0], [0], [1], [0, 0, 1, 1], [], []>} : vector<256x128xbf16>, vector<128x128xbf16>, vector<256x128xf32> -> vector<256x128xf32>
    %29 = vector.broadcast %27 : vector<1x128xf32> to vector<256x128xf32>
    %30 = arith.addf %28, %29 : vector<256x128xf32>
    %cst_23 = arith.constant 0.000000e+00 : f32
    %31 = vector.broadcast %cst_23 : f32 to vector<256x128xf32>
    %32 = arith.maximumf %30, %31 : vector<256x128xf32>
    %33 = arith.truncf %32 : vector<256x128xf32> to vector<256x128xbf16>
    %c0_24 = arith.constant 0 : index
    %c0_25 = arith.constant 0 : index
    %34 = vector.load %arg10[%c0_24, %c0_25] : memref<128x128xbf16, #tpu.memory_space<vmem>>, vector<128x128xbf16>
    %c0_26 = arith.constant 0 : index
    %c0_27 = arith.constant 0 : index
    %35 = vector.load %arg11[%c0_26, %c0_27] : memref<1x128xf32, #tpu.memory_space<vmem>>, vector<1x128xf32>
    %cst_28 = arith.constant dense<0.000000e+00> : vector<256x128xf32>
    %36 = tpu.matmul %33, %34, %cst_28 {dimension_numbers = #tpu.dot_dimension_numbers<[1], [0], [0], [1], [0, 0, 1, 1], [], []>} : vector<256x128xbf16>, vector<128x128xbf16>, vector<256x128xf32> -> vector<256x128xf32>
    %37 = vector.broadcast %35 : vector<1x128xf32> to vector<256x128xf32>
    %38 = arith.addf %36, %37 : vector<256x128xf32>
    %cst_29 = arith.constant 0.000000e+00 : f32
    %39 = vector.broadcast %cst_29 : f32 to vector<256x128xf32>
    %40 = arith.maximumf %38, %39 : vector<256x128xf32>
    %41 = arith.truncf %40 : vector<256x128xf32> to vector<256x128xbf16>
    %c0_30 = arith.constant 0 : index
    %c0_31 = arith.constant 0 : index
    %42 = vector.load %arg12[%c0_30, %c0_31] : memref<128x128xbf16, #tpu.memory_space<vmem>>, vector<128x128xbf16>
    %c0_32 = arith.constant 0 : index
    %c0_33 = arith.constant 0 : index
    %43 = vector.load %arg13[%c0_32, %c0_33] : memref<1x128xf32, #tpu.memory_space<vmem>>, vector<1x128xf32>
    %cst_34 = arith.constant dense<0.000000e+00> : vector<256x128xf32>
    %44 = tpu.matmul %41, %42, %cst_34 {dimension_numbers = #tpu.dot_dimension_numbers<[1], [0], [0], [1], [0, 0, 1, 1], [], []>} : vector<256x128xbf16>, vector<128x128xbf16>, vector<256x128xf32> -> vector<256x128xf32>
    %45 = vector.broadcast %43 : vector<1x128xf32> to vector<256x128xf32>
    %46 = arith.addf %44, %45 : vector<256x128xf32>
    %47 = vector.extract_strided_slice %46 {offsets = [0, 0], sizes = [256, 1], strides = [1, 1]} : vector<256x128xf32> to vector<256x1xf32>
    %c0_35 = arith.constant 0 : index
    %c0_36 = arith.constant 0 : index
    %48 = vector.load %arg14[%c0_35, %c0_36] : memref<256x1xf32, #tpu.memory_space<vmem>>, vector<256x1xf32>
    tpu.vector_store %arg14[%c0_35, %c0_36], %47 {strides = array<i32>} : memref<256x1xf32, #tpu.memory_space<vmem>>, vector<256x1xf32>,
    return
  }
  func.func @transform_0(%arg0: i32) -> (i32, i32) {
    %c0_i32 = arith.constant 0 : i32
    %c0_i32_0 = arith.constant 0 : i32
    return %arg0, %c0_i32 : i32, i32
  }
  func.func @transform_1(%arg0: i32) -> (i32, i32) {
    %c0_i32 = arith.constant 0 : i32
    %c0_i32_0 = arith.constant 0 : i32
    %c0_i32_1 = arith.constant 0 : i32
    return %c0_i32, %c0_i32_0 : i32, i32
  }
  func.func @transform_2(%arg0: i32) -> (i32, i32) {
    %c0_i32 = arith.constant 0 : i32
    %c0_i32_0 = arith.constant 0 : i32
    %c0_i32_1 = arith.constant 0 : i32
    return %c0_i32, %c0_i32_0 : i32, i32
  }
  func.func @transform_3(%arg0: i32) -> (i32, i32) {
    %c0_i32 = arith.constant 0 : i32
    %c0_i32_0 = arith.constant 0 : i32
    %c0_i32_1 = arith.constant 0 : i32
    return %c0_i32, %c0_i32_0 : i32, i32
  }
  func.func @transform_4(%arg0: i32) -> (i32, i32) {
    %c0_i32 = arith.constant 0 : i32
    %c0_i32_0 = arith.constant 0 : i32
    %c0_i32_1 = arith.constant 0 : i32
    return %c0_i32, %c0_i32_0 : i32, i32
  }
  func.func @transform_5(%arg0: i32) -> (i32, i32) {
    %c0_i32 = arith.constant 0 : i32
    %c0_i32_0 = arith.constant 0 : i32
    %c0_i32_1 = arith.constant 0 : i32
    return %c0_i32, %c0_i32_0 : i32, i32
  }
  func.func @transform_6(%arg0: i32) -> (i32, i32) {
    %c0_i32 = arith.constant 0 : i32
    %c0_i32_0 = arith.constant 0 : i32
    %c0_i32_1 = arith.constant 0 : i32
    return %c0_i32, %c0_i32_0 : i32, i32
  }
  func.func @transform_7(%arg0: i32) -> (i32, i32) {
    %c0_i32 = arith.constant 0 : i32
    %c0_i32_0 = arith.constant 0 : i32
    %c0_i32_1 = arith.constant 0 : i32
    return %c0_i32, %c0_i32_0 : i32, i32
  }
  func.func @transform_8(%arg0: i32) -> (i32, i32) {
    %c0_i32 = arith.constant 0 : i32
    %c0_i32_0 = arith.constant 0 : i32
    %c0_i32_1 = arith.constant 0 : i32
    return %c0_i32, %c0_i32_0 : i32, i32
  }
  func.func @transform_9(%arg0: i32) -> (i32, i32) {
    %c0_i32 = arith.constant 0 : i32
    %c0_i32_0 = arith.constant 0 : i32
    %c0_i32_1 = arith.constant 0 : i32
    return %c0_i32, %c0_i32_0 : i32, i32
  }
  func.func @transform_10(%arg0: i32) -> (i32, i32) {
    %c0_i32 = arith.constant 0 : i32
    %c0_i32_0 = arith.constant 0 : i32
    %c0_i32_1 = arith.constant 0 : i32
    return %c0_i32, %c0_i32_0 : i32, i32
  }
  func.func @transform_11(%arg0: i32) -> (i32, i32) {
    %c0_i32 = arith.constant 0 : i32
    %c0_i32_0 = arith.constant 0 : i32
    %c0_i32_1 = arith.constant 0 : i32
    return %c0_i32, %c0_i32_0 : i32, i32
  }
  func.func @transform_12(%arg0: i32) -> (i32, i32) {
    %c0_i32 = arith.constant 0 : i32
    %c0_i32_0 = arith.constant 0 : i32
    %c0_i32_1 = arith.constant 0 : i32
    return %c0_i32, %c0_i32_0 : i32, i32
  }
  func.func @transform_13(%arg0: i32) -> (i32, i32) {
    %c0_i32 = arith.constant 0 : i32
    %c0_i32_0 = arith.constant 0 : i32
    return %arg0, %c0_i32 : i32, i32
  }
}

</mosaic_0001>

<bundles_post_ra>
// kernel: mlp_forward.1
= control target key start
LH: loop header
LB: loop body
LE: loop exit
PB: predicated region body
PF: predicated region fallthrough
CT: control target
= control target key end

     0   :  { %s2848_s25 = smov 0   ;;  %s3354_s0 = inlined_call_operand.vmem [shape: f32[512,32], index: 0, kind: input, shape index: {}]   ;;  %s3355_s1 = inlined_call_operand.vmem [shape: bf16[32,128], index: 1, kind: input, shape index: {}]   ;;  %s3356_s2 = inlined_call_operand.vmem [shape: f32[1,128], index: 2, kind: input, shape index: {}]   ;;  %s3357_s3 = inlined_call_operand.vmem [shape: bf16[128,128], index: 3, kind: input, shape index: {}]   ;;  %s3358_s4 = inlined_call_operand.vmem [shape: f32[1,128], index: 4, kind: input, shape index: {}]   ;;  %s3359_s5 = inlined_call_operand.vmem [shape: bf16[128,128], index: 5, kind: input, shape index: {}]   ;;  %s3360_s6 = inlined_call_operand.vmem [shape: f32[1,128], index: 6, kind: input, shape index: {}]   ;;  %s3361_s7 = inlined_call_operand.vmem [shape: bf16[128,128], index: 7, kind: input, shape index: {}]   ;;  %s3362_s8 = inlined_call_operand.vmem [shape: f32[1,128], index: 8, kind: input, shape index: {}]   ;;  %s3363_s9 = inlined_call_operand.vmem [shape: bf16[128,128], index: 9, kind: input, shape index: {}]   ;;  %s3364_s10 = inlined_call_operand.vmem [shape: f32[1,128], index: 10, kind: input, shape index: {}]   ;;  %s3365_s11 = inlined_call_operand.vmem [shape: bf16[128,128], index: 11, kind: input, shape index: {}]   ;;  %s3366_s12 = inlined_call_operand.vmem [shape: f32[1,128], index: 12, kind: input, shape index: {}]   ;;  %s3367_s13 = inlined_call_operand.vmem [shape: f32[512,1], index: 13, kind: output, shape index: {}]  }
   0x1 LB: > { %s2215_s26 = sadd.s32 4294967295, %s2776_s25   ;;  %p2219_p0 = scmp.ge.s32.totalorder %s2776_s25, 1  ;;  %s2776_s25 = sphi %s2848_s25, %s23_s25  }
   0x2   : > { %p388_p1 = scmp.lt.s32.totalorder %s2776_s25, 3 }
   0x4   : > { %p389_p2 = pnand %p2219_p0, %p388_p1 }
   0x5   : > { %v2728_v0 = vld [vmem:[%s3355_s1] sm:$0xff] (!%p389_p2)   ;;  %s2220_s29 = sshll.u32 (!%p389_p2), %s2215_s26, 5  ;;  %v2729_v1 = vld [vmem:[%s3355_s1 + $0x8] sm:$0xff] (!%p389_p2)   ;;  %v2732_v4 = vld [vmem:[%s3357_s3 + $0x10] sm:$0xff] (!%p389_p2)   ;;  %vm516_vm0 = vcmask (!%p389_p2), 261120   ;;  %vm2126_vm1 = vcmask (!%p389_p2), 7168  }
   0x6   : > { %392 = sbr.rel (%p389_p2) target bundleno = 1404 (0x57c), region = 72  ;;  %p433_p3 = scmp.lt.s32.totalorder (!%p389_p2), %s2220_s29, 63  ;;  %2428 = vmatprep.subr.bf16.mxu0 (!%p389_p2), %v2728_v0  ;;  %v2730_v2 = vld [vmem:[%s3357_s3] sm:$0xff] (!%p389_p2)   ;;  %v2731_v3 = vld [vmem:[%s3357_s3 + $0x8] sm:$0xff] (!%p389_p2)   ;;  %v2733_v14 = vld [vmem:[%s3357_s3 + $0x18] sm:$0xff] (!%p389_p2)  }
   0x7   : > { %2429 = vmatpush3.bf16.msra.mxu0 (!%p389_p2), %v2728_v0  ;;  %2464 = vmatprep.subr.bf16.mxu1 (!%p389_p2), %v2730_v2  ;;  %v2734_v19 = vld [vmem:[%s3357_s3 + $0x20] sm:$0xff] (!%p389_p2)   ;;  %v2735_v24 = vld [vmem:[%s3357_s3 + $0x28] sm:$0xff] (!%p389_p2)   ;;  %v2736_v56 = vld [vmem:[%s3357_s3 + $0x30] sm:$0xff] (!%p389_p2)  }
   0x8   : > { %2430 = vmatprep.subr.bf16.mxu0 (!%p389_p2), %v2729_v1  ;;  %2465 = vmatpush3.bf16.msra.mxu1 (!%p389_p2), %v2730_v2  ;;  %v2737_v57 = vld [vmem:[%s3357_s3 + $0x38] sm:$0xff] (!%p389_p2)   ;;  %v2738_v58 = vld [vmem:[%s3359_s5] sm:$0xff] (!%p389_p2)   ;;  %v2739_v59 = vld [vmem:[%s3359_s5 + $0x8] sm:$0xff] (!%p389_p2)  }
   0x9   : > { %2466 = vmatprep.subr.bf16.mxu1 (!%p389_p2), %v2731_v3  ;;  %v2740_v60 = vld [vmem:[%s3359_s5 + $0x10] sm:$0xff] (!%p389_p2)   ;;  %v2741_v61 = vld [vmem:[%s3359_s5 + $0x18] sm:$0xff] (!%p389_p2)   ;;  %v2742_v62 = vld [vmem:[%s3359_s5 + $0x20] sm:$0xff] (!%p389_p2)  }
   0xa   : > { %v2743_v63 = vld [vmem:[%s3359_s5 + $0x28] sm:$0xff] (!%p389_p2)   ;;  %v2744_v0 = vld [vmem:[%s3359_s5 + $0x30] sm:$0xff] (!%p389_p2)  }
   0xb   : > { %2431 = vmatpush3.bf16.msra.mxu0 (!%p389_p2), %v2729_v1  ;;  %v2968_v1 = vld [vmem:[%s3356_s2] ss:$0 sm:$0xff] (!%p389_p2) }
   0xc   : > { %2467 = vmatpush3.bf16.msra.mxu1 (!%p389_p2), %v2731_v3  ;;  %2512 = vmatprep.subr.bf16.mxu0 (!%p389_p2), %v2738_v58 }
   0xd   : > { %s3369_s29 = smov (!%p433_p3, %s2220_s29), 63  ;;  %2468 = vmatprep.subr.bf16.mxu1 %v2732_v4 }
   0xe   : > { %s2221_s19 = sshll.u32 %s3369_s29, 3 }
   0xf   : > { %s2876_s22 = scalar_lea.vmem %s3354_s0, %s2221_s19  ;;  %s3253_s14 = scalar_lea.vmem %s3367_s13, %s2221_s19 }
  0x10   : > { %v445_v5 = vld [vmem:[%s2876_s22] sm:$0xff]  ;;  %v446_v6 = vld [vmem:[%s2876_s22 + $0x8] sm:$0xff]  ;;  %v447_v7 = vld [vmem:[%s2876_s22 + $0x10] sm:$0xff]  ;;  %2469 = vmatpush3.bf16.msra.mxu1 %v2732_v4 }
  0x11   : > { %v477_v8 = vpack.c.bf16 %v446_v6, %v445_v5  ;;  %v448_v9 = vld [vmem:[%s2876_s22 + $0x18] sm:$0xff]  ;;  %v449_v10 = vld [vmem:[%s2876_s22 + $0x20] sm:$0xff]  ;;  %v450_v11 = vld [vmem:[%s2876_s22 + $0x28] sm:$0xff]  ;;  %2470 = vmatprep.subr.bf16.mxu1 %v2733_v14 }
  0x12   : > { %v478_v12 = vpack.c.bf16 %v448_v9, %v447_v7  ;;  %v479_v13 = vpack.c.bf16 %v450_v11, %v449_v10  ;;  %v451_v15 = vld [vmem:[%s2876_s22 + $0x30] sm:$0xff]  ;;  %v452_v16 = vld [vmem:[%s2876_s22 + $0x38] sm:$0xff]  ;;  %v453_v17 = vld [vmem:[%s2876_s22 + $0x40] sm:$0xff] }
  0x13   : > { %2432 = vmatprep.mubr.msk.bf16.mxu0 %vm516_vm0, %v477_v8  ;;  %v454_v18 = vld [vmem:[%s2876_s22 + $0x48] sm:$0xff]  ;;  %v480_v20 = vpack.c.bf16 %v452_v16, %v451_v15  ;;  %v455_v22 = vld [vmem:[%s2876_s22 + $0x50] sm:$0xff]  ;;  %v456_v23 = vld [vmem:[%s2876_s22 + $0x58] sm:$0xff] }
  0x14   : > { %2433 = vmatmul.mubr.msk.bf16.vlgmr.msra.gmra.mrb[0].mxu0 %vm516_vm0, %v478_v12  ;;  %v481_v21 = vpack.c.bf16 %v454_v18, %v453_v17  ;;  %2471 = vmatpush3.bf16.msra.mxu1 %v2733_v14  ;;  %v457_v25 = vld [vmem:[%s2876_s22 + $0x60] sm:$0xff]  ;;  %v458_v26 = vld [vmem:[%s2876_s22 + $0x68] sm:$0xff]  ;;  %v482_v27 = vpack.c.bf16 %v456_v23, %v455_v22  ;;  %v459_v29 = vld [vmem:[%s2876_s22 + $0x70] sm:$0xff] }
  0x15   : > { %2436 = vmatprep.mubr.msk.bf16.mxu0 %vm516_vm0, %v479_v13  ;;  %2472 = vmatprep.subr.bf16.mxu1 %v2734_v19  ;;  %v483_v28 = vpack.c.bf16 %v458_v26, %v457_v25  ;;  %v460_v30 = vld [vmem:[%s2876_s22 + $0x78] sm:$0xff]  ;;  %v461_v31 = vld [vmem:[%s2876_s22 + $0x80] sm:$0xff]  ;;  %v462_v32 = vld [vmem:[%s2876_s22 + $0x88] sm:$0xff] }
  0x16   : > { %v484_v33 = vpack.c.bf16 %v460_v30, %v459_v29  ;;  %v485_v34 = vpack.c.bf16 %v462_v32, %v461_v31  ;;  %v463_v35 = vld [vmem:[%s2876_s22 + $0x90] sm:$0xff]  ;;  %v464_v36 = vld [vmem:[%s2876_s22 + $0x98] sm:$0xff]  ;;  %v465_v37 = vld [vmem:[%s2876_s22 + $0xa0] sm:$0xff]  ;;  %2513 = vmatpush3.bf16.msra.mxu0 %v2738_v58 }
  0x17   : > { %v466_v38 = vld [vmem:[%s2876_s22 + $0xa8] sm:$0xff]  ;;  %v486_v39 = vpack.c.bf16 %v464_v36, %v463_v35  ;;  %v467_v41 = vld [vmem:[%s2876_s22 + $0xb0] sm:$0xff]  ;;  %v468_v42 = vld [vmem:[%s2876_s22 + $0xb8] sm:$0xff]  ;;  %2514 = vmatprep.subr.bf16.mxu0 %v2739_v59 }
  0x18   : > { %2473 = vmatpush3.bf16.msra.mxu1 %v2734_v19  ;;  %v487_v40 = vpack.c.bf16 %v466_v38, %v465_v37  ;;  %v469_v43 = vld [vmem:[%s2876_s22 + $0xc0] sm:$0xff]  ;;  %v470_v44 = vld [vmem:[%s2876_s22 + $0xc8] sm:$0xff]  ;;  %v488_v45 = vpack.c.bf16 %v468_v42, %v467_v41  ;;  %v471_v47 = vld [vmem:[%s2876_s22 + $0xd0] sm:$0xff] }
  0x19   : > { %2474 = vmatprep.subr.bf16.mxu1 %v2735_v24  ;;  %v489_v46 = vpack.c.bf16 %v470_v44, %v469_v43  ;;  %v472_v48 = vld [vmem:[%s2876_s22 + $0xd8] sm:$0xff]  ;;  %v473_v49 = vld [vmem:[%s2876_s22 + $0xe0] sm:$0xff]  ;;  %v474_v50 = vld [vmem:[%s2876_s22 + $0xe8] sm:$0xff] }
  0x1a   : > { %v490_v51 = vpack.c.bf16 %v472_v48, %v471_v47  ;;  %v491_v52 = vpack.c.bf16 %v474_v50, %v473_v49  ;;  %v475_v53 = vld [vmem:[%s2876_s22 + $0xf0] sm:$0xff]  ;;  %v476_v54 = vld [vmem:[%s2876_s22 + $0xf8] sm:$0xff]  ;;  %2515 = vmatpush3.bf16.msra.mxu0 %v2739_v59 }
  0x1b   : > { %v492_v55 = vpack.c.bf16 %v476_v54, %v475_v53  ;;  %2516 = vmatprep.subr.bf16.mxu0 %v2740_v60 }
  0x1c   : > { %2437 = vmatmul.mubr.msk.bf16.gmra.mrb[4].mxu0 %vm516_vm0, %v480_v20  ;;  %2475 = vmatpush3.bf16.msra.mxu1 %v2735_v24 }
  0x1d   : > { %2440 = vmatprep.mubr.msk.bf16.mxu0 %vm516_vm0, %v481_v21  ;;  %2476 = vmatprep.subr.bf16.mxu1 %v2736_v56 }
  0x1e   : > { %2517 = vmatpush3.bf16.msra.mxu0 %v2740_v60 }
  0x1f   : > { %2518 = vmatprep.subr.bf16.mxu0 %v2741_v61 }
  0x20   : > { %2477 = vmatpush3.bf16.msra.mxu1 %v2736_v56 }
  0x21   : > { %2478 = vmatprep.subr.bf16.mxu1 %v2737_v57 }
  0x22   : > { %2519 = vmatpush3.bf16.msra.mxu0 %v2741_v61 }
  0x23   : > { %2520 = vmatprep.subr.bf16.mxu0 %v2742_v62 }
  0x24   : > { %2441 = vmatmul.mubr.msk.bf16.gmra.mrb[8].mxu0 %vm516_vm0, %v482_v27  ;;  %2479 = vmatpush3.bf16.msra.mxu1 %v2737_v57 }
  0x25   : > { %2444 = vmatprep.mubr.msk.bf16.mxu0 %vm516_vm0, %v483_v28 }
  0x26   : > { %2521 = vmatpush3.bf16.msra.mxu0 %v2742_v62 }
  0x27   : > { %2522 = vmatprep.subr.bf16.mxu0 %v2743_v63 }
  0x2a   : > { %2523 = vmatpush3.bf16.msra.mxu0 %v2743_v63 }
  0x2b   : > { %2524 = vmatprep.subr.bf16.mxu0 %v2744_v0 }
  0x2c   : > { %2445 = vmatmul.mubr.msk.bf16.gmra.mrb[12].mxu0 %vm516_vm0, %v484_v33 }
  0x2d   : > { %2448 = vmatprep.mubr.msk.bf16.mxu0 %vm516_vm0, %v485_v34 }
  0x2e   : > { %2525 = vmatpush3.bf16.msra.mxu0 %v2744_v0 }
  0x34   : > { %2449 = vmatmul.mubr.msk.bf16.gmra.mrb[16].mxu0 %vm516_vm0, %v486_v39 }
  0x35   : > { %2452 = vmatprep.mubr.msk.bf16.mxu0 %vm516_vm0, %v487_v40 }
  0x3c   : > { %2453 = vmatmul.mubr.msk.bf16.gmra.mrb[20].mxu0 %vm516_vm0, %v488_v45 }
  0x3d   : > { %2456 = vmatprep.mubr.msk.bf16.mxu0 %vm516_vm0, %v489_v46 }
  0x44   : > { %2457 = vmatmul.mubr.msk.bf16.gmra.mrb[24].mxu0 %vm516_vm0, %v490_v51 }
  0x45   : > { %2460 = vmatprep.mubr.msk.bf16.mxu0 %vm516_vm0, %v491_v52 }
  0x4c   : > { %2461 = vmatmul.mubr.msk.bf16.gmra.mrb[28].mxu0 %vm516_vm0, %v492_v55 }
  0xe7   : > { %v2434_v2 = vpop.f32.mrb[0].mxu0 }
  0xe8   : > { %v608_v3 = vadd.f32 %v2434_v2, %v2968_v1  ;;  %v599_v4 = vpop.f32.mrb[1].mxu0 }
  0xe9   : > { %v600_v5 = vadd.f32 %v2968_v1, %v599_v4  ;;  %v2435_v6 = vpop.f32.mrb[2].mxu0 }
  0xea   : > { %v611_v7 = vadd.f32 %v2435_v6, %v2968_v1  ;;  %v602_v8 = vpop.f32.mrb[3].mxu0  ;;  %v728_v10 = vmax.f32 %v608_v3, 0.0 }
  0xeb   : > { %v603_v9 = vadd.f32 %v2968_v1, %v602_v8  ;;  %v726_v12 = vmax.f32 %v600_v5, 0.0 }
  0xec   : > { %v729_v11 = vmax.f32 %v611_v7, 0.0 }
  0xed   : > { %v727_v13 = vmax.f32 %v603_v9, 0.0 }
  0xee   : > { %v759_v14 = vpack.c.bf16 %v729_v11, %v728_v10 }
  0xef   : > { %v2438_v15 = vpop.f32.mrb[4].mxu0  ;;  %v758_v16 = vpack.c.bf16 %v727_v13, %v726_v12 }
  0xf0   : > { %v624_v17 = vadd.f32 %v2438_v15, %v2968_v1  ;;  %v615_v18 = vpop.f32.mrb[5].mxu0 }
  0xf1   : > { %v616_v19 = vadd.f32 %v2968_v1, %v615_v18  ;;  %v2439_v20 = vpop.f32.mrb[6].mxu0  ;;  %2480 = vmatprep.mubr.bf16.mxu1 %v758_v16 }
  0xf2   : > { %v627_v21 = vadd.f32 %v2439_v20, %v2968_v1  ;;  %v618_v22 = vpop.f32.mrb[7].mxu0  ;;  %2481 = vmatmul.mubr.bf16.vlgmr.msra.gmra.mrb[0].mxu1 %v759_v14  ;;  %v732_v24 = vmax.f32 %v624_v17, 0.0 }
  0xf3   : > { %v619_v23 = vadd.f32 %v2968_v1, %v618_v22  ;;  %v730_v26 = vmax.f32 %v616_v19, 0.0 }
  0xf4   : > { %v733_v25 = vmax.f32 %v627_v21, 0.0 }
  0xf5   : > { %v731_v27 = vmax.f32 %v619_v23, 0.0 }
  0xf6   : > { %v761_v28 = vpack.c.bf16 %v733_v25, %v732_v24 }
  0xf7   : > { %v760_v29 = vpack.c.bf16 %v731_v27, %v730_v26  ;;  %v2442_v30 = vpop.f32.mrb[8].mxu0 }
  0xf8   : > { %v640_v31 = vadd.f32 %v2442_v30, %v2968_v1  ;;  %v631_v32 = vpop.f32.mrb[9].mxu0 }
  0xf9   : > { %v632_v33 = vadd.f32 %v2968_v1, %v631_v32  ;;  %v2443_v34 = vpop.f32.mrb[10].mxu0  ;;  %2484 = vmatprep.mubr.bf16.mxu1 %v760_v29 }
  0xfa   : > { %v643_v35 = vadd.f32 %v2443_v34, %v2968_v1  ;;  %v634_v36 = vpop.f32.mrb[11].mxu0  ;;  %2485 = vmatmul.mubr.bf16.gmra.mrb[4].mxu1 %v761_v28  ;;  %v736_v38 = vmax.f32 %v640_v31, 0.0 }
  0xfb   : > { %v635_v37 = vadd.f32 %v2968_v1, %v634_v36  ;;  %v734_v40 = vmax.f32 %v632_v33, 0.0 }
  0xfc   : > { %v737_v39 = vmax.f32 %v643_v35, 0.0 }
  0xfd   : > { %v735_v41 = vmax.f32 %v635_v37, 0.0 }
  0xfe   : > { %v763_v42 = vpack.c.bf16 %v737_v39, %v736_v38 }
  0xff   : > { %v762_v43 = vpack.c.bf16 %v735_v41, %v734_v40  ;;  %v2446_v44 = vpop.f32.mrb[12].mxu0 }
 0x100   : > { %v656_v45 = vadd.f32 %v2446_v44, %v2968_v1  ;;  %v647_v46 = vpop.f32.mrb[13].mxu0 }
 0x101   : > { %v648_v47 = vadd.f32 %v2968_v1, %v647_v46  ;;  %v2447_v48 = vpop.f32.mrb[14].mxu0  ;;  %2488 = vmatprep.mubr.bf16.mxu1 %v762_v43 }
 0x102   : > { %v659_v49 = vadd.f32 %v2447_v48, %v2968_v1  ;;  %v650_v50 = vpop.f32.mrb[15].mxu0  ;;  %2489 = vmatmul.mubr.bf16.gmra.mrb[8].mxu1 %v763_v42  ;;  %v740_v52 = vmax.f32 %v656_v45, 0.0 }
 0x103   : > { %v651_v51 = vadd.f32 %v2968_v1, %v650_v50  ;;  %v738_v54 = vmax.f32 %v648_v47, 0.0 }
 0x104   : > { %v741_v53 = vmax.f32 %v659_v49, 0.0 }
 0x105   : > { %v739_v55 = vmax.f32 %v651_v51, 0.0  ;;  %v2745_v51 = vld [vmem:[%s3359_s5 + $0x38] sm:$0xff]  }
 0x106   : > { %v765_v56 = vpack.c.bf16 %v741_v53, %v740_v52  ;;  %2526 = vmatprep.subr.bf16.mxu0 %v2745_v51  ;;  %v2746_v52 = vld [vmem:[%s3361_s7] sm:$0xff]   ;;  %v2748_v53 = vld [vmem:[%s3361_s7 + $0x10] sm:$0xff]  }
 0x107   : > { %v764_v57 = vpack.c.bf16 %v739_v55, %v738_v54  ;;  %v2450_v58 = vpop.f32.mrb[16].mxu0  ;;  %2527 = vmatpush3.bf16.msra.mxu0 %v2745_v51  ;;  %2560 = vmatprep.subr.bf16.mxu1 %v2746_v52  ;;  %v2749_v54 = vld [vmem:[%s3361_s7 + $0x18] sm:$0xff]   ;;  %v2750_v55 = vld [vmem:[%s3361_s7 + $0x20] sm:$0xff]  }
 0x108   : > { %v672_v59 = vadd.f32 %v2450_v58, %v2968_v1  ;;  %v663_v60 = vpop.f32.mrb[17].mxu0  ;;  %2561 = vmatpush3.bf16.msra.mxu1 %v2746_v52  ;;  %v3029_v58 = vld [vmem:[%s3358_s4] ss:$0 sm:$0xff] }
 0x109   : > { %v664_v61 = vadd.f32 %v2968_v1, %v663_v60  ;;  %v2451_v62 = vpop.f32.mrb[18].mxu0  ;;  %2492 = vmatprep.mubr.bf16.mxu1 %v764_v57  ;;  %v2752_v57 = vld [vmem:[%s3361_s7 + $0x30] sm:$0xff]  }
 0x10a   : > { %v675_v63 = vadd.f32 %v2451_v62, %v2968_v1  ;;  %v666_v0 = vpop.f32.mrb[19].mxu0  ;;  %2493 = vmatmul.mubr.bf16.gmra.mrb[12].mxu1 %v765_v56  ;;  %v744_v3 = vmax.f32 %v672_v59, 0.0  ;;  %v2751_v56 = vld [vmem:[%s3361_s7 + $0x28] sm:$0xff]  }
 0x10b   : > { %v667_v2 = vadd.f32 %v2968_v1, %v666_v0  ;;  %v742_v5 = vmax.f32 %v664_v61, 0.0 }
 0x10c   : > { %v745_v4 = vmax.f32 %v675_v63, 0.0 }
 0x10d   : > { %v743_v6 = vmax.f32 %v667_v2, 0.0 }
 0x10e   : > { %v767_v7 = vpack.c.bf16 %v745_v4, %v744_v3 }
 0x10f   : > { %v766_v8 = vpack.c.bf16 %v743_v6, %v742_v5  ;;  %v2454_v9 = vpop.f32.mrb[20].mxu0 }
 0x110   : > { %v688_v10 = vadd.f32 %v2454_v9, %v2968_v1  ;;  %v679_v11 = vpop.f32.mrb[21].mxu0 }
 0x111   : > { %v680_v12 = vadd.f32 %v2968_v1, %v679_v11  ;;  %v2455_v13 = vpop.f32.mrb[22].mxu0  ;;  %2496 = vmatprep.mubr.bf16.mxu1 %v766_v8 }
 0x112   : > { %v691_v14 = vadd.f32 %v2455_v13, %v2968_v1  ;;  %v682_v15 = vpop.f32.mrb[23].mxu0  ;;  %2497 = vmatmul.mubr.bf16.gmra.mrb[16].mxu1 %v767_v7  ;;  %v748_v17 = vmax.f32 %v688_v10, 0.0 }
 0x113   : > { %v683_v16 = vadd.f32 %v2968_v1, %v682_v15  ;;  %v746_v19 = vmax.f32 %v680_v12, 0.0 }
 0x114   : > { %v749_v18 = vmax.f32 %v691_v14, 0.0 }
 0x115   : > { %v747_v20 = vmax.f32 %v683_v16, 0.0 }
 0x116   : > { %v769_v21 = vpack.c.bf16 %v749_v18, %v748_v17 }
 0x117   : > { %v768_v22 = vpack.c.bf16 %v747_v20, %v746_v19  ;;  %v2458_v23 = vpop.f32.mrb[24].mxu0 }
 0x118   : > { %v704_v24 = vadd.f32 %v2458_v23, %v2968_v1  ;;  %v695_v25 = vpop.f32.mrb[25].mxu0 }
 0x119   : > { %v696_v26 = vadd.f32 %v2968_v1, %v695_v25  ;;  %v2459_v27 = vpop.f32.mrb[26].mxu0  ;;  %2500 = vmatprep.mubr.bf16.mxu1 %v768_v22 }
 0x11a   : > { %v707_v28 = vadd.f32 %v2459_v27, %v2968_v1  ;;  %v698_v29 = vpop.f32.mrb[27].mxu0  ;;  %2501 = vmatmul.mubr.bf16.gmra.mrb[20].mxu1 %v769_v21  ;;  %v752_v31 = vmax.f32 %v704_v24, 0.0 }
 0x11b   : > { %v699_v30 = vadd.f32 %v2968_v1, %v698_v29  ;;  %v750_v33 = vmax.f32 %v696_v26, 0.0 }
 0x11c   : > { %v753_v32 = vmax.f32 %v707_v28, 0.0 }
 0x11d   : > { %v751_v34 = vmax.f32 %v699_v30, 0.0 }
 0x11e   : > { %v771_v35 = vpack.c.bf16 %v753_v32, %v752_v31 }
 0x11f   : > { %v770_v36 = vpack.c.bf16 %v751_v34, %v750_v33  ;;  %v2462_v37 = vpop.f32.mrb[28].mxu0 }
 0x120   : > { %v720_v38 = vadd.f32 %v2462_v37, %v2968_v1  ;;  %v711_v39 = vpop.f32.mrb[29].mxu0 }
 0x121   : > { %v712_v40 = vadd.f32 %v2968_v1, %v711_v39  ;;  %v2463_v41 = vpop.f32.mrb[30].mxu0  ;;  %2504 = vmatprep.mubr.bf16.mxu1 %v770_v36 }
 0x122   : > { %v723_v42 = vadd.f32 %v2463_v41, %v2968_v1  ;;  %v714_v43 = vpop.f32.mrb[31].mxu0  ;;  %2505 = vmatmul.mubr.bf16.gmra.mrb[24].mxu1 %v771_v35  ;;  %v756_v45 = vmax.f32 %v720_v38, 0.0 }
 0x123   : > { %v715_v44 = vadd.f32 %v2968_v1, %v714_v43  ;;  %v754_v47 = vmax.f32 %v712_v40, 0.0  ;;  %v2747_v1 = vld [vmem:[%s3361_s7 + $0x8] sm:$0xff]  }
 0x124   : > { %v757_v46 = vmax.f32 %v723_v42, 0.0  ;;  %2562 = vmatprep.subr.bf16.mxu1 %v2747_v1 }
 0x125   : > { %v755_v48 = vmax.f32 %v715_v44, 0.0  ;;  %2563 = vmatpush3.bf16.msra.mxu1 %v2747_v1 }
 0x126   : > { %v773_v49 = vpack.c.bf16 %v757_v46, %v756_v45  ;;  %2564 = vmatprep.subr.bf16.mxu1 %v2748_v53 }
 0x127   : > { %v772_v50 = vpack.c.bf16 %v755_v48, %v754_v47 }
 0x129   : > { %2508 = vmatprep.mubr.bf16.mxu1 %v772_v50  ;;  %2565 = vmatpush3.bf16.msra.mxu1 %v2748_v53 }
 0x12a   : > { %2509 = vmatmul.mubr.bf16.gmra.mrb[28].mxu1 %v773_v49  ;;  %2566 = vmatprep.subr.bf16.mxu1 %v2749_v54 }
 0x12d   : > { %2567 = vmatpush3.bf16.msra.mxu1 %v2749_v54 }
 0x12e   : > { %2568 = vmatprep.subr.bf16.mxu1 %v2750_v55 }
 0x131   : > { %2569 = vmatpush3.bf16.msra.mxu1 %v2750_v55 }
 0x132   : > { %2570 = vmatprep.subr.bf16.mxu1 %v2751_v56 }
 0x135   : > { %2571 = vmatpush3.bf16.msra.mxu1 %v2751_v56 }
 0x136   : > { %2572 = vmatprep.subr.bf16.mxu1 %v2752_v57 }
 0x139   : > { %2573 = vmatpush3.bf16.msra.mxu1 %v2752_v57 }
 0x1c5   : > { %v2482_v59 = vpop.f32.mrb[0].mxu1 }
 0x1c6   : > { %v888_v60 = vadd.f32 %v2482_v59, %v3029_v58  ;;  %v879_v61 = vpop.f32.mrb[1].mxu1 }
 0x1c7   : > { %v880_v62 = vadd.f32 %v3029_v58, %v879_v61  ;;  %v2483_v63 = vpop.f32.mrb[2].mxu1 }
 0x1c8   : > { %v891_v0 = vadd.f32 %v2483_v63, %v3029_v58  ;;  %v882_v2 = vpop.f32.mrb[3].mxu1  ;;  %v1008_v4 = vmax.f32 %v888_v60, 0.0 }
 0x1c9   : > { %v883_v3 = vadd.f32 %v3029_v58, %v882_v2  ;;  %v1006_v6 = vmax.f32 %v880_v62, 0.0 }
 0x1ca   : > { %v1009_v5 = vmax.f32 %v891_v0, 0.0 }
 0x1cb   : > { %v1007_v7 = vmax.f32 %v883_v3, 0.0 }
 0x1cc   : > { %v1039_v8 = vpack.c.bf16 %v1009_v5, %v1008_v4 }
 0x1cd   : > { %v1038_v9 = vpack.c.bf16 %v1007_v7, %v1006_v6  ;;  %v2486_v10 = vpop.f32.mrb[4].mxu1 }
 0x1ce   : > { %v904_v11 = vadd.f32 %v2486_v10, %v3029_v58  ;;  %v895_v12 = vpop.f32.mrb[5].mxu1 }
 0x1cf   : > { %v896_v13 = vadd.f32 %v3029_v58, %v895_v12  ;;  %v2487_v14 = vpop.f32.mrb[6].mxu1  ;;  %2528 = vmatprep.mubr.bf16.mxu0 %v1038_v9 }
 0x1d0   : > { %v907_v15 = vadd.f32 %v2487_v14, %v3029_v58  ;;  %v898_v16 = vpop.f32.mrb[7].mxu1  ;;  %2529 = vmatmul.mubr.bf16.vlgmr.msra.gmra.mrb[32].mxu0 %v1039_v8  ;;  %v1012_v18 = vmax.f32 %v904_v11, 0.0 }
 0x1d1   : > { %v899_v17 = vadd.f32 %v3029_v58, %v898_v16  ;;  %v1010_v20 = vmax.f32 %v896_v13, 0.0 }
 0x1d2   : > { %v1013_v19 = vmax.f32 %v907_v15, 0.0 }
 0x1d3   : > { %v1011_v21 = vmax.f32 %v899_v17, 0.0 }
 0x1d4   : > { %v1041_v22 = vpack.c.bf16 %v1013_v19, %v1012_v18 }
 0x1d5   : > { %v1040_v23 = vpack.c.bf16 %v1011_v21, %v1010_v20  ;;  %v2490_v24 = vpop.f32.mrb[8].mxu1 }
 0x1d6   : > { %v920_v25 = vadd.f32 %v2490_v24, %v3029_v58  ;;  %v911_v26 = vpop.f32.mrb[9].mxu1 }
 0x1d7   : > { %v912_v27 = vadd.f32 %v3029_v58, %v911_v26  ;;  %v2491_v28 = vpop.f32.mrb[10].mxu1  ;;  %2532 = vmatprep.mubr.bf16.mxu0 %v1040_v23 }
 0x1d8   : > { %v923_v29 = vadd.f32 %v2491_v28, %v3029_v58  ;;  %v914_v30 = vpop.f32.mrb[11].mxu1  ;;  %2533 = vmatmul.mubr.bf16.gmra.mrb[36].mxu0 %v1041_v22  ;;  %v1016_v32 = vmax.f32 %v920_v25, 0.0 }
 0x1d9   : > { %v915_v31 = vadd.f32 %v3029_v58, %v914_v30  ;;  %v1014_v34 = vmax.f32 %v912_v27, 0.0 }
 0x1da   : > { %v1017_v33 = vmax.f32 %v923_v29, 0.0 }
 0x1db   : > { %v1015_v35 = vmax.f32 %v915_v31, 0.0 }
 0x1dc   : > { %v1043_v36 = vpack.c.bf16 %v1017_v33, %v1016_v32 }
 0x1dd   : > { %v1042_v37 = vpack.c.bf16 %v1015_v35, %v1014_v34  ;;  %v2494_v38 = vpop.f32.mrb[12].mxu1 }
 0x1de   : > { %v936_v39 = vadd.f32 %v2494_v38, %v3029_v58  ;;  %v927_v40 = vpop.f32.mrb[13].mxu1 }
 0x1df   : > { %v928_v41 = vadd.f32 %v3029_v58, %v927_v40  ;;  %v2495_v42 = vpop.f32.mrb[14].mxu1  ;;  %2536 = vmatprep.mubr.bf16.mxu0 %v1042_v37 }
 0x1e0   : > { %v939_v43 = vadd.f32 %v2495_v42, %v3029_v58  ;;  %v930_v44 = vpop.f32.mrb[15].mxu1  ;;  %2537 = vmatmul.mubr.bf16.gmra.mrb[40].mxu0 %v1043_v36  ;;  %v1020_v46 = vmax.f32 %v936_v39, 0.0 }
 0x1e1   : > { %v931_v45 = vadd.f32 %v3029_v58, %v930_v44  ;;  %v1018_v48 = vmax.f32 %v928_v41, 0.0 }
 0x1e2   : > { %v1021_v47 = vmax.f32 %v939_v43, 0.0 }
 0x1e3   : > { %v1019_v49 = vmax.f32 %v931_v45, 0.0  ;;  %v2753_v45 = vld [vmem:[%s3361_s7 + $0x38] sm:$0xff]  }
 0x1e4   : > { %v1045_v50 = vpack.c.bf16 %v1021_v47, %v1020_v46  ;;  %2574 = vmatprep.subr.bf16.mxu1 %v2753_v45  ;;  %v2754_v46 = vld [vmem:[%s3363_s9] sm:$0xff]   ;;  %v2756_v47 = vld [vmem:[%s3363_s9 + $0x10] sm:$0xff]  }
 0x1e5   : > { %v1044_v51 = vpack.c.bf16 %v1019_v49, %v1018_v48  ;;  %v2498_v52 = vpop.f32.mrb[16].mxu1  ;;  %2575 = vmatpush3.bf16.msra.mxu1 %v2753_v45  ;;  %2608 = vmatprep.subr.bf16.mxu0 %v2754_v46  ;;  %v2757_v48 = vld [vmem:[%s3363_s9 + $0x18] sm:$0xff]   ;;  %v2758_v49 = vld [vmem:[%s3363_s9 + $0x20] sm:$0xff]  }
 0x1e6   : > { %v952_v1 = vadd.f32 %v2498_v52, %v3029_v58  ;;  %v943_v53 = vpop.f32.mrb[17].mxu1  ;;  %2609 = vmatpush3.bf16.msra.mxu0 %v2754_v46  ;;  %v3090_v52 = vld [vmem:[%s3360_s6] ss:$0 sm:$0xff] }
 0x1e7   : > { %v944_v54 = vadd.f32 %v3029_v58, %v943_v53  ;;  %v2499_v55 = vpop.f32.mrb[18].mxu1  ;;  %2540 = vmatprep.mubr.bf16.mxu0 %v1044_v51  ;;  %v2760_v51 = vld [vmem:[%s3363_s9 + $0x30] sm:$0xff]  }
 0x1e8   : > { %v955_v56 = vadd.f32 %v2499_v55, %v3029_v58  ;;  %v946_v57 = vpop.f32.mrb[19].mxu1  ;;  %2541 = vmatmul.mubr.bf16.gmra.mrb[44].mxu0 %v1045_v50  ;;  %v1024_v60 = vmax.f32 %v952_v1, 0.0  ;;  %v2759_v50 = vld [vmem:[%s3363_s9 + $0x28] sm:$0xff]  }
 0x1e9   : > { %v947_v59 = vadd.f32 %v3029_v58, %v946_v57  ;;  %v1022_v62 = vmax.f32 %v944_v54, 0.0 }
 0x1ea   : > { %v1025_v61 = vmax.f32 %v955_v56, 0.0 }
 0x1eb   : > { %v1023_v63 = vmax.f32 %v947_v59, 0.0 }
 0x1ec   : > { %v1047_v0 = vpack.c.bf16 %v1025_v61, %v1024_v60 }
 0x1ed   : > { %v1046_v2 = vpack.c.bf16 %v1023_v63, %v1022_v62  ;;  %v2502_v3 = vpop.f32.mrb[20].mxu1 }
 0x1ee   : > { %v968_v4 = vadd.f32 %v2502_v3, %v3029_v58  ;;  %v959_v5 = vpop.f32.mrb[21].mxu1 }
 0x1ef   : > { %v960_v6 = vadd.f32 %v3029_v58, %v959_v5  ;;  %v2503_v7 = vpop.f32.mrb[22].mxu1  ;;  %2544 = vmatprep.mubr.bf16.mxu0 %v1046_v2 }
 0x1f0   : > { %v971_v8 = vadd.f32 %v2503_v7, %v3029_v58  ;;  %v962_v9 = vpop.f32.mrb[23].mxu1  ;;  %2545 = vmatmul.mubr.bf16.gmra.mrb[48].mxu0 %v1047_v0  ;;  %v1028_v11 = vmax.f32 %v968_v4, 0.0 }
 0x1f1   : > { %v963_v10 = vadd.f32 %v3029_v58, %v962_v9  ;;  %v1026_v13 = vmax.f32 %v960_v6, 0.0 }
 0x1f2   : > { %v1029_v12 = vmax.f32 %v971_v8, 0.0 }
 0x1f3   : > { %v1027_v14 = vmax.f32 %v963_v10, 0.0 }
 0x1f4   : > { %v1049_v15 = vpack.c.bf16 %v1029_v12, %v1028_v11 }
 0x1f5   : > { %v1048_v16 = vpack.c.bf16 %v1027_v14, %v1026_v13  ;;  %v2506_v17 = vpop.f32.mrb[24].mxu1 }
 0x1f6   : > { %v984_v18 = vadd.f32 %v2506_v17, %v3029_v58  ;;  %v975_v19 = vpop.f32.mrb[25].mxu1 }
 0x1f7   : > { %v976_v20 = vadd.f32 %v3029_v58, %v975_v19  ;;  %v2507_v21 = vpop.f32.mrb[26].mxu1  ;;  %2548 = vmatprep.mubr.bf16.mxu0 %v1048_v16 }
 0x1f8   : > { %v987_v22 = vadd.f32 %v2507_v21, %v3029_v58  ;;  %v978_v23 = vpop.f32.mrb[27].mxu1  ;;  %2549 = vmatmul.mubr.bf16.gmra.mrb[52].mxu0 %v1049_v15  ;;  %v1032_v25 = vmax.f32 %v984_v18, 0.0 }
 0x1f9   : > { %v979_v24 = vadd.f32 %v3029_v58, %v978_v23  ;;  %v1030_v27 = vmax.f32 %v976_v20, 0.0 }
 0x1fa   : > { %v1033_v26 = vmax.f32 %v987_v22, 0.0 }
 0x1fb   : > { %v1031_v28 = vmax.f32 %v979_v24, 0.0 }
 0x1fc   : > { %v1051_v29 = vpack.c.bf16 %v1033_v26, %v1032_v25 }
 0x1fd   : > { %v1050_v30 = vpack.c.bf16 %v1031_v28, %v1030_v27  ;;  %v2510_v31 = vpop.f32.mrb[28].mxu1 }
 0x1fe   : > { %v1000_v32 = vadd.f32 %v2510_v31, %v3029_v58  ;;  %v991_v33 = vpop.f32.mrb[29].mxu1 }
 0x1ff   : > { %v992_v34 = vadd.f32 %v3029_v58, %v991_v33  ;;  %v2511_v35 = vpop.f32.mrb[30].mxu1  ;;  %2552 = vmatprep.mubr.bf16.mxu0 %v1050_v30 }
 0x200   : > { %v1003_v36 = vadd.f32 %v2511_v35, %v3029_v58  ;;  %v994_v37 = vpop.f32.mrb[31].mxu1  ;;  %2553 = vmatmul.mubr.bf16.gmra.mrb[56].mxu0 %v1051_v29  ;;  %v1036_v39 = vmax.f32 %v1000_v32, 0.0 }
 0x201   : > { %v995_v38 = vadd.f32 %v3029_v58, %v994_v37  ;;  %v1034_v41 = vmax.f32 %v992_v34, 0.0  ;;  %v2755_v58 = vld [vmem:[%s3363_s9 + $0x8] sm:$0xff]  }
 0x202   : > { %v1037_v40 = vmax.f32 %v1003_v36, 0.0  ;;  %2610 = vmatprep.subr.bf16.mxu0 %v2755_v58 }
 0x203   : > { %v1035_v42 = vmax.f32 %v995_v38, 0.0  ;;  %2611 = vmatpush3.bf16.msra.mxu0 %v2755_v58 }
 0x204   : > { %v1053_v43 = vpack.c.bf16 %v1037_v40, %v1036_v39  ;;  %2612 = vmatprep.subr.bf16.mxu0 %v2756_v47 }
 0x205   : > { %v1052_v44 = vpack.c.bf16 %v1035_v42, %v1034_v41 }
 0x207   : > { %2556 = vmatprep.mubr.bf16.mxu0 %v1052_v44  ;;  %2613 = vmatpush3.bf16.msra.mxu0 %v2756_v47 }
 0x208   : > { %2557 = vmatmul.mubr.bf16.gmra.mrb[60].mxu0 %v1053_v43  ;;  %2614 = vmatprep.subr.bf16.mxu0 %v2757_v48 }
 0x20b   : > { %2615 = vmatpush3.bf16.msra.mxu0 %v2757_v48 }
 0x20c   : > { %2616 = vmatprep.subr.bf16.mxu0 %v2758_v49 }
 0x20f   : > { %2617 = vmatpush3.bf16.msra.mxu0 %v2758_v49 }
 0x210   : > { %2618 = vmatprep.subr.bf16.mxu0 %v2759_v50 }
 0x213   : > { %2619 = vmatpush3.bf16.msra.mxu0 %v2759_v50 }
 0x214   : > { %2620 = vmatprep.subr.bf16.mxu0 %v2760_v51 }
 0x217   : > { %2621 = vmatpush3.bf16.msra.mxu0 %v2760_v51 }
 0x2a3   : > { %v2530_v1 = vpop.f32.mrb[32].mxu0 }
 0x2a4   : > { %v1168_v53 = vadd.f32 %v2530_v1, %v3090_v52  ;;  %v1159_v54 = vpop.f32.mrb[33].mxu0 }
 0x2a5   : > { %v1160_v55 = vadd.f32 %v3090_v52, %v1159_v54  ;;  %v2531_v56 = vpop.f32.mrb[34].mxu0 }
 0x2a6   : > { %v1171_v57 = vadd.f32 %v2531_v56, %v3090_v52  ;;  %v1162_v59 = vpop.f32.mrb[35].mxu0  ;;  %v1288_v61 = vmax.f32 %v1168_v53, 0.0 }
 0x2a7   : > { %v1163_v60 = vadd.f32 %v3090_v52, %v1162_v59  ;;  %v1286_v63 = vmax.f32 %v1160_v55, 0.0 }
 0x2a8   : > { %v1289_v62 = vmax.f32 %v1171_v57, 0.0 }
 0x2a9   : > { %v1287_v0 = vmax.f32 %v1163_v60, 0.0 }
 0x2aa   : > { %v1319_v2 = vpack.c.bf16 %v1289_v62, %v1288_v61 }
 0x2ab   : > { %v1318_v3 = vpack.c.bf16 %v1287_v0, %v1286_v63  ;;  %v2534_v4 = vpop.f32.mrb[36].mxu0 }
 0x2ac   : > { %v1184_v5 = vadd.f32 %v2534_v4, %v3090_v52  ;;  %v1175_v6 = vpop.f32.mrb[37].mxu0 }
 0x2ad   : > { %v1176_v7 = vadd.f32 %v3090_v52, %v1175_v6  ;;  %v2535_v8 = vpop.f32.mrb[38].mxu0  ;;  %2576 = vmatprep.mubr.bf16.mxu1 %v1318_v3 }
 0x2ae   : > { %v1187_v9 = vadd.f32 %v2535_v8, %v3090_v52  ;;  %v1178_v10 = vpop.f32.mrb[39].mxu0  ;;  %2577 = vmatmul.mubr.bf16.vlgmr.msra.gmra.mrb[32].mxu1 %v1319_v2  ;;  %v1292_v12 = vmax.f32 %v1184_v5, 0.0 }
 0x2af   : > { %v1179_v11 = vadd.f32 %v3090_v52, %v1178_v10  ;;  %v1290_v14 = vmax.f32 %v1176_v7, 0.0 }
 0x2b0   : > { %v1293_v13 = vmax.f32 %v1187_v9, 0.0 }
 0x2b1   : > { %v1291_v15 = vmax.f32 %v1179_v11, 0.0 }
 0x2b2   : > { %v1321_v16 = vpack.c.bf16 %v1293_v13, %v1292_v12 }
 0x2b3   : > { %v1320_v17 = vpack.c.bf16 %v1291_v15, %v1290_v14  ;;  %v2538_v18 = vpop.f32.mrb[40].mxu0 }
 0x2b4   : > { %v1200_v19 = vadd.f32 %v2538_v18, %v3090_v52  ;;  %v1191_v20 = vpop.f32.mrb[41].mxu0 }
 0x2b5   : > { %v1192_v21 = vadd.f32 %v3090_v52, %v1191_v20  ;;  %v2539_v22 = vpop.f32.mrb[42].mxu0  ;;  %2580 = vmatprep.mubr.bf16.mxu1 %v1320_v17 }
 0x2b6   : > { %v1203_v23 = vadd.f32 %v2539_v22, %v3090_v52  ;;  %v1194_v24 = vpop.f32.mrb[43].mxu0  ;;  %2581 = vmatmul.mubr.bf16.gmra.mrb[36].mxu1 %v1321_v16  ;;  %v1296_v26 = vmax.f32 %v1200_v19, 0.0 }
 0x2b7   : > { %v1195_v25 = vadd.f32 %v3090_v52, %v1194_v24  ;;  %v1294_v28 = vmax.f32 %v1192_v21, 0.0 }
 0x2b8   : > { %v1297_v27 = vmax.f32 %v1203_v23, 0.0 }
 0x2b9   : > { %v1295_v29 = vmax.f32 %v1195_v25, 0.0 }
 0x2ba   : > { %v1323_v30 = vpack.c.bf16 %v1297_v27, %v1296_v26 }
 0x2bb   : > { %v1322_v31 = vpack.c.bf16 %v1295_v29, %v1294_v28  ;;  %v2542_v32 = vpop.f32.mrb[44].mxu0 }
 0x2bc   : > { %v1216_v33 = vadd.f32 %v2542_v32, %v3090_v52  ;;  %v1207_v34 = vpop.f32.mrb[45].mxu0 }
 0x2bd   : > { %v1208_v35 = vadd.f32 %v3090_v52, %v1207_v34  ;;  %v2543_v36 = vpop.f32.mrb[46].mxu0  ;;  %2584 = vmatprep.mubr.bf16.mxu1 %v1322_v31 }
 0x2be   : > { %v1219_v37 = vadd.f32 %v2543_v36, %v3090_v52  ;;  %v1210_v38 = vpop.f32.mrb[47].mxu0  ;;  %2585 = vmatmul.mubr.bf16.gmra.mrb[40].mxu1 %v1323_v30  ;;  %v1300_v40 = vmax.f32 %v1216_v33, 0.0 }
 0x2bf   : > { %v1211_v39 = vadd.f32 %v3090_v52, %v1210_v38  ;;  %v1298_v42 = vmax.f32 %v1208_v35, 0.0 }
 0x2c0   : > { %v1301_v41 = vmax.f32 %v1219_v37, 0.0 }
 0x2c1   : > { %v1299_v43 = vmax.f32 %v1211_v39, 0.0  ;;  %v2761_v39 = vld [vmem:[%s3363_s9 + $0x38] sm:$0xff]  }
 0x2c2   : > { %v1325_v44 = vpack.c.bf16 %v1301_v41, %v1300_v40  ;;  %2622 = vmatprep.subr.bf16.mxu0 %v2761_v39  ;;  %v2762_v40 = vld [vmem:[%s3365_s11] sm:$0xff]   ;;  %v2764_v41 = vld [vmem:[%s3365_s11 + $0x10] sm:$0xff]  }
 0x2c3   : > { %v1324_v45 = vpack.c.bf16 %v1299_v43, %v1298_v42  ;;  %v2546_v46 = vpop.f32.mrb[48].mxu0  ;;  %2623 = vmatpush3.bf16.msra.mxu0 %v2761_v39  ;;  %2704 = vmatprep.subr.bf16.mxu1 %v2762_v40  ;;  %v3139_v42 = vld [vmem:[%s3365_s11 + $0x18] sm:$0xff]   ;;  %v3145_v43 = vld [vmem:[%s3365_s11 + $0x20] sm:$0xff]  }
 0x2c4   : > { %v1232_v58 = vadd.f32 %v2546_v46, %v3090_v52  ;;  %v1223_v47 = vpop.f32.mrb[49].mxu0  ;;  %2656 = vmatprep.subr.bf16.mxu0 %v2762_v40  ;;  %2712 = vmatpush3.bf16.msra.mxu1 %v2762_v40 }
 0x2c5   : > { %v1224_v48 = vadd.f32 %v3090_v52, %v1223_v47  ;;  %v2547_v49 = vpop.f32.mrb[50].mxu0  ;;  %2588 = vmatprep.mubr.bf16.mxu1 %v1324_v45  ;;  %v3160_v45 = vld [vmem:[%s3362_s8] ss:$0 sm:$0xff] }
 0x2c6   : > { %v1235_v50 = vadd.f32 %v2547_v49, %v3090_v52  ;;  %v1226_v51 = vpop.f32.mrb[51].mxu0  ;;  %2589 = vmatmul.mubr.bf16.gmra.mrb[44].mxu1 %v1325_v44  ;;  %v1304_v53 = vmax.f32 %v1232_v58, 0.0  ;;  %v3152_v44 = vld [vmem:[%s3365_s11 + $0x28] sm:$0xff]  }
 0x2c7   : > { %v1227_v1 = vadd.f32 %v3090_v52, %v1226_v51  ;;  %v1302_v55 = vmax.f32 %v1224_v48, 0.0 }
 0x2c8   : > { %v1305_v54 = vmax.f32 %v1235_v50, 0.0 }
 0x2c9   : > { %v1303_v56 = vmax.f32 %v1227_v1, 0.0 }
 0x2ca   : > { %v1327_v57 = vpack.c.bf16 %v1305_v54, %v1304_v53 }
 0x2cb   : > { %v1326_v59 = vpack.c.bf16 %v1303_v56, %v1302_v55  ;;  %v2550_v60 = vpop.f32.mrb[52].mxu0 }
 0x2cc   : > { %v1248_v61 = vadd.f32 %v2550_v60, %v3090_v52  ;;  %v1239_v62 = vpop.f32.mrb[53].mxu0 }
 0x2cd   : > { %v1240_v63 = vadd.f32 %v3090_v52, %v1239_v62  ;;  %v2551_v0 = vpop.f32.mrb[54].mxu0  ;;  %2592 = vmatprep.mubr.bf16.mxu1 %v1326_v59 }
 0x2ce   : > { %v1251_v2 = vadd.f32 %v2551_v0, %v3090_v52  ;;  %v1242_v3 = vpop.f32.mrb[55].mxu0  ;;  %2593 = vmatmul.mubr.bf16.gmra.mrb[48].mxu1 %v1327_v57  ;;  %v1308_v5 = vmax.f32 %v1248_v61, 0.0 }
 0x2cf   : > { %v1243_v4 = vadd.f32 %v3090_v52, %v1242_v3  ;;  %v1306_v7 = vmax.f32 %v1240_v63, 0.0 }
 0x2d0   : > { %v1309_v6 = vmax.f32 %v1251_v2, 0.0 }
 0x2d1   : > { %v1307_v8 = vmax.f32 %v1243_v4, 0.0 }
 0x2d2   : > { %v1329_v9 = vpack.c.bf16 %v1309_v6, %v1308_v5 }
 0x2d3   : > { %v1328_v10 = vpack.c.bf16 %v1307_v8, %v1306_v7  ;;  %v2554_v11 = vpop.f32.mrb[56].mxu0 }
 0x2d4   : > { %v1264_v12 = vadd.f32 %v2554_v11, %v3090_v52  ;;  %v1255_v13 = vpop.f32.mrb[57].mxu0 }
 0x2d5   : > { %v1256_v14 = vadd.f32 %v3090_v52, %v1255_v13  ;;  %v2555_v15 = vpop.f32.mrb[58].mxu0  ;;  %2596 = vmatprep.mubr.bf16.mxu1 %v1328_v10 }
 0x2d6   : > { %v1267_v16 = vadd.f32 %v2555_v15, %v3090_v52  ;;  %v1258_v17 = vpop.f32.mrb[59].mxu0  ;;  %2597 = vmatmul.mubr.bf16.gmra.mrb[52].mxu1 %v1329_v9  ;;  %v1312_v19 = vmax.f32 %v1264_v12, 0.0 }
 0x2d7   : > { %v1259_v18 = vadd.f32 %v3090_v52, %v1258_v17  ;;  %v1310_v21 = vmax.f32 %v1256_v14, 0.0 }
 0x2d8   : > { %v1313_v20 = vmax.f32 %v1267_v16, 0.0 }
 0x2d9   : > { %v1311_v22 = vmax.f32 %v1259_v18, 0.0 }
 0x2da   : > { %v1331_v23 = vpack.c.bf16 %v1313_v20, %v1312_v19 }
 0x2db   : > { %v1330_v24 = vpack.c.bf16 %v1311_v22, %v1310_v21  ;;  %v2558_v25 = vpop.f32.mrb[60].mxu0 }
 0x2dc   : > { %v1280_v26 = vadd.f32 %v2558_v25, %v3090_v52  ;;  %v1271_v27 = vpop.f32.mrb[61].mxu0 }
 0x2dd   : > { %v1272_v28 = vadd.f32 %v3090_v52, %v1271_v27  ;;  %v2559_v29 = vpop.f32.mrb[62].mxu0  ;;  %2600 = vmatprep.mubr.bf16.mxu1 %v1330_v24 }
 0x2de   : > { %v1283_v30 = vadd.f32 %v2559_v29, %v3090_v52  ;;  %v1274_v31 = vpop.f32.mrb[63].mxu0  ;;  %2601 = vmatmul.mubr.bf16.gmra.mrb[56].mxu1 %v1331_v23  ;;  %v1316_v33 = vmax.f32 %v1280_v26, 0.0 }
 0x2df   : > { %v1275_v32 = vadd.f32 %v3090_v52, %v1274_v31  ;;  %v1314_v35 = vmax.f32 %v1272_v28, 0.0  ;;  %v2763_v52 = vld [vmem:[%s3365_s11 + $0x8] sm:$0xff]  }
 0x2e0   : > { %v1317_v34 = vmax.f32 %v1283_v30, 0.0  ;;  %2705 = vmatprep.subr.bf16.mxu1 %v2763_v52 }
 0x2e1   : > { %v1315_v36 = vmax.f32 %v1275_v32, 0.0  ;;  %2713 = vmatpush3.bf16.msra.mxu1 %v2763_v52 }
 0x2e2   : > { %v1333_v37 = vpack.c.bf16 %v1317_v34, %v1316_v33  ;;  %2706 = vmatprep.subr.bf16.mxu1 %v2764_v41 }
 0x2e3   : > { %v1332_v38 = vpack.c.bf16 %v1315_v36, %v1314_v35 }
 0x2e5   : > { %2604 = vmatprep.mubr.bf16.mxu1 %v1332_v38  ;;  %2714 = vmatpush3.bf16.msra.mxu1 %v2764_v41 }
 0x2e6   : > { %2605 = vmatmul.mubr.bf16.gmra.mrb[60].mxu1 %v1333_v37  ;;  %2707 = vmatprep.subr.bf16.mxu1 %v3139_v42 }
 0x2e9   : > { %2715 = vmatpush3.bf16.msra.mxu1 %v3139_v42 }
 0x2ea   : > { %2708 = vmatprep.subr.bf16.mxu1 %v3145_v43 }
 0x2ed   : > { %2716 = vmatpush3.bf16.msra.mxu1 %v3145_v43 }
 0x2ee   : > { %2709 = vmatprep.subr.bf16.mxu1 %v3152_v44 }
 0x2f1   : > { %2717 = vmatpush3.bf16.msra.mxu1 %v3152_v44 }
 0x381   : > { %v2578_v46 = vpop.f32.mrb[32].mxu1 }
 0x382   : > { %v1448_v58 = vadd.f32 %v2578_v46, %v3160_v45  ;;  %v1439_v47 = vpop.f32.mrb[33].mxu1 }
 0x383   : > { %v1440_v48 = vadd.f32 %v3160_v45, %v1439_v47  ;;  %v2579_v49 = vpop.f32.mrb[34].mxu1 }
 0x384   : > { %v1451_v50 = vadd.f32 %v2579_v49, %v3160_v45  ;;  %v1442_v51 = vpop.f32.mrb[35].mxu1  ;;  %v1568_v53 = vmax.f32 %v1448_v58, 0.0 }
 0x385   : > { %v1443_v1 = vadd.f32 %v3160_v45, %v1442_v51  ;;  %v1566_v55 = vmax.f32 %v1440_v48, 0.0 }
 0x386   : > { %v1569_v54 = vmax.f32 %v1451_v50, 0.0 }
 0x387   : > { %v1567_v56 = vmax.f32 %v1443_v1, 0.0 }
 0x388   : > { %v1599_v57 = vpack.c.bf16 %v1569_v54, %v1568_v53 }
 0x389   : > { %v1598_v59 = vpack.c.bf16 %v1567_v56, %v1566_v55  ;;  %v2582_v60 = vpop.f32.mrb[36].mxu1 }
 0x38a   : > { %v1464_v61 = vadd.f32 %v2582_v60, %v3160_v45  ;;  %v1455_v62 = vpop.f32.mrb[37].mxu1 }
 0x38b   : > { %v1456_v63 = vadd.f32 %v3160_v45, %v1455_v62  ;;  %v2583_v0 = vpop.f32.mrb[38].mxu1  ;;  %2624 = vmatprep.mubr.bf16.mxu0 %v1598_v59 }
 0x38c   : > { %v1467_v2 = vadd.f32 %v2583_v0, %v3160_v45  ;;  %v1458_v3 = vpop.f32.mrb[39].mxu1  ;;  %2625 = vmatmul.mubr.bf16.vlgmr.msra.gmra.mrb[64].mxu0 %v1599_v57  ;;  %v1572_v5 = vmax.f32 %v1464_v61, 0.0 }
 0x38d   : > { %v1459_v4 = vadd.f32 %v3160_v45, %v1458_v3  ;;  %2657 = vmatpush3.bf16.msra.mxu0 %v2762_v40  ;;  %v1570_v7 = vmax.f32 %v1456_v63, 0.0 }
 0x38e   : > { %v1573_v6 = vmax.f32 %v1467_v2, 0.0  ;;  %2658 = vmatprep.subr.bf16.mxu0 %v2763_v52 }
 0x38f   : > { %v1571_v8 = vmax.f32 %v1459_v4, 0.0 }
 0x390   : > { %v1601_v9 = vpack.c.bf16 %v1573_v6, %v1572_v5 }
 0x391   : > { %v1600_v10 = vpack.c.bf16 %v1571_v8, %v1570_v7  ;;  %v2586_v11 = vpop.f32.mrb[40].mxu1  ;;  %2659 = vmatpush3.bf16.msra.mxu0 %v2763_v52 }
 0x392   : > { %v1480_v12 = vadd.f32 %v2586_v11, %v3160_v45  ;;  %v1471_v13 = vpop.f32.mrb[41].mxu1  ;;  %2660 = vmatprep.subr.bf16.mxu0 %v2764_v41 }
 0x393   : > { %v1472_v14 = vadd.f32 %v3160_v45, %v1471_v13  ;;  %v2587_v15 = vpop.f32.mrb[42].mxu1  ;;  %2628 = vmatprep.mubr.bf16.mxu0 %v1600_v10 }
 0x394   : > { %v1483_v16 = vadd.f32 %v2587_v15, %v3160_v45  ;;  %v1474_v17 = vpop.f32.mrb[43].mxu1  ;;  %2629 = vmatmul.mubr.bf16.gmra.mrb[68].mxu0 %v1601_v9  ;;  %v1576_v19 = vmax.f32 %v1480_v12, 0.0 }
 0x395   : > { %v1475_v18 = vadd.f32 %v3160_v45, %v1474_v17  ;;  %2661 = vmatpush3.bf16.msra.mxu0 %v2764_v41  ;;  %v1574_v21 = vmax.f32 %v1472_v14, 0.0 }
 0x396   : > { %v1577_v20 = vmax.f32 %v1483_v16, 0.0  ;;  %2662 = vmatprep.subr.bf16.mxu0 %v3139_v42 }
 0x397   : > { %v1575_v22 = vmax.f32 %v1475_v18, 0.0 }
 0x398   : > { %v1603_v23 = vpack.c.bf16 %v1577_v20, %v1576_v19 }
 0x399   : > { %v1602_v24 = vpack.c.bf16 %v1575_v22, %v1574_v21  ;;  %v2590_v25 = vpop.f32.mrb[44].mxu1  ;;  %2663 = vmatpush3.bf16.msra.mxu0 %v3139_v42 }
 0x39a   : > { %v1496_v26 = vadd.f32 %v2590_v25, %v3160_v45  ;;  %v1487_v27 = vpop.f32.mrb[45].mxu1  ;;  %2664 = vmatprep.subr.bf16.mxu0 %v3145_v43 }
 0x39b   : > { %v1488_v28 = vadd.f32 %v3160_v45, %v1487_v27  ;;  %v2591_v29 = vpop.f32.mrb[46].mxu1  ;;  %2632 = vmatprep.mubr.bf16.mxu0 %v1602_v24 }
 0x39c   : > { %v1499_v30 = vadd.f32 %v2591_v29, %v3160_v45  ;;  %v1490_v31 = vpop.f32.mrb[47].mxu1  ;;  %2633 = vmatmul.mubr.bf16.gmra.mrb[72].mxu0 %v1603_v23  ;;  %v1580_v33 = vmax.f32 %v1496_v26, 0.0 }
 0x39d   : > { %v1491_v32 = vadd.f32 %v3160_v45, %v1490_v31  ;;  %2665 = vmatpush3.bf16.msra.mxu0 %v3145_v43  ;;  %v1578_v35 = vmax.f32 %v1488_v28, 0.0 }
 0x39e   : > { %v1581_v34 = vmax.f32 %v1499_v30, 0.0  ;;  %2666 = vmatprep.subr.bf16.mxu0 %v3152_v44 }
 0x39f   : > { %v1579_v36 = vmax.f32 %v1491_v32, 0.0  ;;  %v2768_v32 = vld [vmem:[%s3365_s11 + $0x30] sm:$0xff]  }
 0x3a0   : > { %v1605_v37 = vpack.c.bf16 %v1581_v34, %v1580_v33  ;;  %2710 = vmatprep.subr.bf16.mxu1 %v2768_v32  ;;  %v3209_v33 = vld [vmem:[%s3364_s10] ss:$0 sm:$0xff] }
 0x3a1   : > { %v1604_v38 = vpack.c.bf16 %v1579_v36, %v1578_v35  ;;  %v2594_v39 = vpop.f32.mrb[48].mxu1  ;;  %2667 = vmatpush3.bf16.msra.mxu0 %v3152_v44  ;;  %2718 = vmatpush3.bf16.msra.mxu1 %v2768_v32 }
 0x3a2   : > { %v1512_v40 = vadd.f32 %v2594_v39, %v3160_v45  ;;  %v1503_v52 = vpop.f32.mrb[49].mxu1  ;;  %2668 = vmatprep.subr.bf16.mxu0 %v2768_v32 }
 0x3a3   : > { %v1504_v41 = vadd.f32 %v3160_v45, %v1503_v52  ;;  %v2595_v42 = vpop.f32.mrb[50].mxu1  ;;  %2636 = vmatprep.mubr.bf16.mxu0 %v1604_v38 }
 0x3a4   : > { %v1515_v43 = vadd.f32 %v2595_v42, %v3160_v45  ;;  %v1506_v46 = vpop.f32.mrb[51].mxu1  ;;  %2637 = vmatmul.mubr.bf16.gmra.mrb[76].mxu0 %v1605_v37  ;;  %v1584_v47 = vmax.f32 %v1512_v40, 0.0 }
 0x3a5   : > { %v1507_v58 = vadd.f32 %v3160_v45, %v1506_v46  ;;  %v1582_v49 = vmax.f32 %v1504_v41, 0.0  ;;  %2669 = vmatpush3.bf16.msra.mxu0 %v2768_v32 }
 0x3a6   : > { %v1585_v48 = vmax.f32 %v1515_v43, 0.0 }
 0x3a7   : > { %v1583_v50 = vmax.f32 %v1507_v58, 0.0 }
 0x3a8   : > { %v1607_v51 = vpack.c.bf16 %v1585_v48, %v1584_v47 }
 0x3a9   : > { %v1606_v1 = vpack.c.bf16 %v1583_v50, %v1582_v49  ;;  %v2598_v44 = vpop.f32.mrb[52].mxu1 }
 0x3aa   : > { %v1528_v53 = vadd.f32 %v2598_v44, %v3160_v45  ;;  %v1519_v54 = vpop.f32.mrb[53].mxu1 }
 0x3ab   : > { %v1520_v55 = vadd.f32 %v3160_v45, %v1519_v54  ;;  %v2599_v56 = vpop.f32.mrb[54].mxu1  ;;  %2640 = vmatprep.mubr.bf16.mxu0 %v1606_v1 }
 0x3ac   : > { %v1531_v57 = vadd.f32 %v2599_v56, %v3160_v45  ;;  %v1522_v59 = vpop.f32.mrb[55].mxu1  ;;  %2641 = vmatmul.mubr.bf16.gmra.mrb[80].mxu0 %v1607_v51  ;;  %v1588_v61 = vmax.f32 %v1528_v53, 0.0 }
 0x3ad   : > { %v1523_v60 = vadd.f32 %v3160_v45, %v1522_v59  ;;  %v1586_v63 = vmax.f32 %v1520_v55, 0.0 }
 0x3ae   : > { %v1589_v62 = vmax.f32 %v1531_v57, 0.0 }
 0x3af   : > { %v1587_v0 = vmax.f32 %v1523_v60, 0.0 }
 0x3b0   : > { %v1609_v2 = vpack.c.bf16 %v1589_v62, %v1588_v61 }
 0x3b1   : > { %v1608_v3 = vpack.c.bf16 %v1587_v0, %v1586_v63  ;;  %v2602_v4 = vpop.f32.mrb[56].mxu1 }
 0x3b2   : > { %v1544_v5 = vadd.f32 %v2602_v4, %v3160_v45  ;;  %v1535_v6 = vpop.f32.mrb[57].mxu1 }
 0x3b3   : > { %v1536_v7 = vadd.f32 %v3160_v45, %v1535_v6  ;;  %v2603_v8 = vpop.f32.mrb[58].mxu1  ;;  %2644 = vmatprep.mubr.bf16.mxu0 %v1608_v3 }
 0x3b4   : > { %v1547_v9 = vadd.f32 %v2603_v8, %v3160_v45  ;;  %v1538_v10 = vpop.f32.mrb[59].mxu1  ;;  %2645 = vmatmul.mubr.bf16.gmra.mrb[84].mxu0 %v1609_v2  ;;  %v1592_v12 = vmax.f32 %v1544_v5, 0.0 }
 0x3b5   : > { %v1539_v11 = vadd.f32 %v3160_v45, %v1538_v10  ;;  %v1590_v14 = vmax.f32 %v1536_v7, 0.0 }
 0x3b6   : > { %v1593_v13 = vmax.f32 %v1547_v9, 0.0 }
 0x3b7   : > { %v1591_v15 = vmax.f32 %v1539_v11, 0.0 }
 0x3b8   : > { %v1611_v16 = vpack.c.bf16 %v1593_v13, %v1592_v12 }
 0x3b9   : > { %v1610_v17 = vpack.c.bf16 %v1591_v15, %v1590_v14  ;;  %v2606_v18 = vpop.f32.mrb[60].mxu1 }
 0x3ba   : > { %v1560_v19 = vadd.f32 %v2606_v18, %v3160_v45  ;;  %v1551_v20 = vpop.f32.mrb[61].mxu1 }
 0x3bb   : > { %v1552_v21 = vadd.f32 %v3160_v45, %v1551_v20  ;;  %v2607_v22 = vpop.f32.mrb[62].mxu1  ;;  %2648 = vmatprep.mubr.bf16.mxu0 %v1610_v17 }
 0x3bc   : > { %v1563_v23 = vadd.f32 %v2607_v22, %v3160_v45  ;;  %v1554_v24 = vpop.f32.mrb[63].mxu1  ;;  %2649 = vmatmul.mubr.bf16.gmra.mrb[88].mxu0 %v1611_v16  ;;  %v1596_v26 = vmax.f32 %v1560_v19, 0.0 }
 0x3bd   : > { %v1555_v25 = vadd.f32 %v3160_v45, %v1554_v24  ;;  %v1594_v28 = vmax.f32 %v1552_v21, 0.0  ;;  %v2769_v45 = vld [vmem:[%s3365_s11 + $0x38] sm:$0xff]  }
 0x3be   : > { %v1597_v27 = vmax.f32 %v1563_v23, 0.0  ;;  %2670 = vmatprep.subr.bf16.mxu0 %v2769_v45  ;;  %2711 = vmatprep.subr.bf16.mxu1 %v2769_v45 }
 0x3bf   : > { %v1595_v29 = vmax.f32 %v1555_v25, 0.0  ;;  %2671 = vmatpush3.bf16.msra.mxu0 %v2769_v45  ;;  %2719 = vmatpush3.bf16.msra.mxu1 %v2769_v45 }
 0x3c0   : > { %v1613_v30 = vpack.c.bf16 %v1597_v27, %v1596_v26 }
 0x3c1   : > { %v1612_v31 = vpack.c.bf16 %v1595_v29, %v1594_v28 }
 0x3c3   : > { %2652 = vmatprep.mubr.bf16.mxu0 %v1612_v31 }
 0x3c4   : > { %2653 = vmatmul.mubr.bf16.gmra.mrb[92].mxu0 %v1613_v30 }
 0x45f   : > { %v2626_v34 = vpop.f32.mrb[64].mxu0 }
 0x460   : > { %v1728_v35 = vadd.f32 %v2626_v34, %v3209_v33  ;;  %v1719_v36 = vpop.f32.mrb[65].mxu0 }
 0x461   : > { %v1720_v37 = vadd.f32 %v3209_v33, %v1719_v36  ;;  %v2627_v38 = vpop.f32.mrb[66].mxu0 }
 0x462   : > { %v1731_v39 = vadd.f32 %v2627_v38, %v3209_v33  ;;  %v1722_v40 = vpop.f32.mrb[67].mxu0  ;;  %v1848_v41 = vmax.f32 %v1728_v35, 0.0 }
 0x463   : > { %v1723_v52 = vadd.f32 %v3209_v33, %v1722_v40  ;;  %v1846_v43 = vmax.f32 %v1720_v37, 0.0 }
 0x464   : > { %v1849_v42 = vmax.f32 %v1731_v39, 0.0 }
 0x465   : > { %v1847_v46 = vmax.f32 %v1723_v52, 0.0 }
 0x466   : > { %v1879_v58 = vpack.c.bf16 %v1849_v42, %v1848_v41 }
 0x467   : > { %v1878_v47 = vpack.c.bf16 %v1847_v46, %v1846_v43  ;;  %v2630_v48 = vpop.f32.mrb[68].mxu0 }
 0x468   : > { %v1744_v49 = vadd.f32 %v2630_v48, %v3209_v33  ;;  %v1735_v50 = vpop.f32.mrb[69].mxu0 }
 0x469   : > { %v1736_v51 = vadd.f32 %v3209_v33, %v1735_v50  ;;  %v2631_v1 = vpop.f32.mrb[70].mxu0  ;;  %2672 = vmatprep.mubr.bf16.mxu0 %v1878_v47 }
 0x46a   : > { %v1747_v44 = vadd.f32 %v2631_v1, %v3209_v33  ;;  %v1738_v53 = vpop.f32.mrb[71].mxu0  ;;  %2673 = vmatmul.mubr.bf16.vlgmr.msra.gmra.mrb[96].mxu0 %v1879_v58  ;;  %v1852_v55 = vmax.f32 %v1744_v49, 0.0 }
 0x46b   : > { %v1739_v54 = vadd.f32 %v3209_v33, %v1738_v53  ;;  %v1850_v57 = vmax.f32 %v1736_v51, 0.0 }
 0x46c   : > { %v1853_v56 = vmax.f32 %v1747_v44, 0.0 }
 0x46d   : > { %v1851_v59 = vmax.f32 %v1739_v54, 0.0 }
 0x46e   : > { %v1881_v60 = vpack.c.bf16 %v1853_v56, %v1852_v55 }
 0x46f   : > { %v1880_v61 = vpack.c.bf16 %v1851_v59, %v1850_v57  ;;  %v2634_v62 = vpop.f32.mrb[72].mxu0 }
 0x470   : > { %v1760_v63 = vadd.f32 %v2634_v62, %v3209_v33  ;;  %v1751_v0 = vpop.f32.mrb[73].mxu0 }
 0x471   : > { %v1752_v2 = vadd.f32 %v3209_v33, %v1751_v0  ;;  %v2635_v3 = vpop.f32.mrb[74].mxu0  ;;  %2676 = vmatprep.mubr.bf16.mxu1 %v1880_v61 }
 0x472   : > { %v1763_v4 = vadd.f32 %v2635_v3, %v3209_v33  ;;  %v1754_v5 = vpop.f32.mrb[75].mxu0  ;;  %2677 = vmatmul.mubr.bf16.vlgmr.msra.gmra.mrb[64].mxu1 %v1881_v60  ;;  %v1856_v7 = vmax.f32 %v1760_v63, 0.0 }
 0x473   : > { %v1755_v6 = vadd.f32 %v3209_v33, %v1754_v5  ;;  %v1854_v9 = vmax.f32 %v1752_v2, 0.0 }
 0x474   : > { %v1857_v8 = vmax.f32 %v1763_v4, 0.0 }
 0x475   : > { %v1855_v10 = vmax.f32 %v1755_v6, 0.0 }
 0x476   : > { %v1883_v11 = vpack.c.bf16 %v1857_v8, %v1856_v7 }
 0x477   : > { %v1882_v12 = vpack.c.bf16 %v1855_v10, %v1854_v9  ;;  %v2638_v13 = vpop.f32.mrb[76].mxu0 }
 0x478   : > { %v1776_v14 = vadd.f32 %v2638_v13, %v3209_v33  ;;  %v1767_v15 = vpop.f32.mrb[77].mxu0 }
 0x479   : > { %v1768_v16 = vadd.f32 %v3209_v33, %v1767_v15  ;;  %v2639_v17 = vpop.f32.mrb[78].mxu0  ;;  %2680 = vmatprep.mubr.bf16.mxu1 %v1882_v12 }
 0x47a   : > { %v1779_v18 = vadd.f32 %v2639_v17, %v3209_v33  ;;  %v1770_v19 = vpop.f32.mrb[79].mxu0  ;;  %2681 = vmatmul.mubr.bf16.gmra.mrb[68].mxu1 %v1883_v11  ;;  %v1860_v21 = vmax.f32 %v1776_v14, 0.0 }
 0x47b   : > { %v1771_v20 = vadd.f32 %v3209_v33, %v1770_v19  ;;  %v1858_v23 = vmax.f32 %v1768_v16, 0.0 }
 0x47c   : > { %v1861_v22 = vmax.f32 %v1779_v18, 0.0 }
 0x47d   : > { %v1859_v24 = vmax.f32 %v1771_v20, 0.0  ;;  %v3246_v20 = vld [vmem:[%s3366_s12] ss:$0 sm:$0xff] }
 0x47e   : > { %v1885_v25 = vpack.c.bf16 %v1861_v22, %v1860_v21 }
 0x47f   : > { %v1884_v26 = vpack.c.bf16 %v1859_v24, %v1858_v23  ;;  %v2642_v27 = vpop.f32.mrb[80].mxu0 }
 0x480   : > { %v1792_v28 = vadd.f32 %v2642_v27, %v3209_v33  ;;  %v1783_v29 = vpop.f32.mrb[81].mxu0 }
 0x481   : > { %v1784_v30 = vadd.f32 %v3209_v33, %v1783_v29  ;;  %v2643_v31 = vpop.f32.mrb[82].mxu0  ;;  %2684 = vmatprep.mubr.bf16.mxu1 %v1884_v26 }
 0x482   : > { %v1795_v32 = vadd.f32 %v2643_v31, %v3209_v33  ;;  %v1786_v45 = vpop.f32.mrb[83].mxu0  ;;  %2685 = vmatmul.mubr.bf16.gmra.mrb[72].mxu1 %v1885_v25  ;;  %v1864_v35 = vmax.f32 %v1792_v28, 0.0 }
 0x483   : > { %v1787_v34 = vadd.f32 %v3209_v33, %v1786_v45  ;;  %v1862_v37 = vmax.f32 %v1784_v30, 0.0 }
 0x484   : > { %v1865_v36 = vmax.f32 %v1795_v32, 0.0 }
 0x485   : > { %v1863_v38 = vmax.f32 %v1787_v34, 0.0 }
 0x486   : > { %v1887_v39 = vpack.c.bf16 %v1865_v36, %v1864_v35 }
 0x487   : > { %v1886_v40 = vpack.c.bf16 %v1863_v38, %v1862_v37  ;;  %v2646_v52 = vpop.f32.mrb[84].mxu0 }
 0x488   : > { %v1808_v41 = vadd.f32 %v2646_v52, %v3209_v33  ;;  %v1799_v42 = vpop.f32.mrb[85].mxu0 }
 0x489   : > { %v1800_v43 = vadd.f32 %v3209_v33, %v1799_v42  ;;  %v2647_v46 = vpop.f32.mrb[86].mxu0  ;;  %2688 = vmatprep.mubr.bf16.mxu1 %v1886_v40 }
 0x48a   : > { %v1811_v58 = vadd.f32 %v2647_v46, %v3209_v33  ;;  %v1802_v47 = vpop.f32.mrb[87].mxu0  ;;  %2689 = vmatmul.mubr.bf16.gmra.mrb[76].mxu1 %v1887_v39  ;;  %v1868_v49 = vmax.f32 %v1808_v41, 0.0 }
 0x48b   : > { %v1803_v48 = vadd.f32 %v3209_v33, %v1802_v47  ;;  %v1866_v51 = vmax.f32 %v1800_v43, 0.0 }
 0x48c   : > { %v1869_v50 = vmax.f32 %v1811_v58, 0.0 }
 0x48d   : > { %v1867_v1 = vmax.f32 %v1803_v48, 0.0 }
 0x48e   : > { %v1889_v44 = vpack.c.bf16 %v1869_v50, %v1868_v49 }
 0x48f   : > { %v1888_v53 = vpack.c.bf16 %v1867_v1, %v1866_v51  ;;  %v2650_v54 = vpop.f32.mrb[88].mxu0 }
 0x490   : > { %v1824_v55 = vadd.f32 %v2650_v54, %v3209_v33  ;;  %v1815_v56 = vpop.f32.mrb[89].mxu0 }
 0x491   : > { %v1816_v57 = vadd.f32 %v3209_v33, %v1815_v56  ;;  %v2651_v59 = vpop.f32.mrb[90].mxu0  ;;  %2692 = vmatprep.mubr.bf16.mxu1 %v1888_v53 }
 0x492   : > { %v1827_v60 = vadd.f32 %v2651_v59, %v3209_v33  ;;  %v1818_v61 = vpop.f32.mrb[91].mxu0  ;;  %2693 = vmatmul.mubr.bf16.gmra.mrb[80].mxu1 %v1889_v44  ;;  %v1872_v63 = vmax.f32 %v1824_v55, 0.0 }
 0x493   : > { %v1819_v62 = vadd.f32 %v3209_v33, %v1818_v61  ;;  %v1870_v2 = vmax.f32 %v1816_v57, 0.0 }
 0x494   : > { %v1873_v0 = vmax.f32 %v1827_v60, 0.0 }
 0x495   : > { %v1871_v3 = vmax.f32 %v1819_v62, 0.0 }
 0x496   : > { %v1891_v4 = vpack.c.bf16 %v1873_v0, %v1872_v63 }
 0x497   : > { %v1890_v5 = vpack.c.bf16 %v1871_v3, %v1870_v2  ;;  %v2654_v6 = vpop.f32.mrb[92].mxu0 }
 0x498   : > { %v1840_v7 = vadd.f32 %v2654_v6, %v3209_v33  ;;  %v1831_v8 = vpop.f32.mrb[93].mxu0 }
 0x499   : > { %v1832_v9 = vadd.f32 %v3209_v33, %v1831_v8  ;;  %v2655_v10 = vpop.f32.mrb[94].mxu0  ;;  %2696 = vmatprep.mubr.bf16.mxu1 %v1890_v5 }
 0x49a   : > { %v1843_v11 = vadd.f32 %v2655_v10, %v3209_v33  ;;  %v1834_v12 = vpop.f32.mrb[95].mxu0  ;;  %2697 = vmatmul.mubr.bf16.gmra.mrb[84].mxu1 %v1891_v4  ;;  %v1876_v14 = vmax.f32 %v1840_v7, 0.0 }
 0x49b   : > { %v1835_v13 = vadd.f32 %v3209_v33, %v1834_v12  ;;  %v1874_v16 = vmax.f32 %v1832_v9, 0.0 }
 0x49c   : > { %v1877_v15 = vmax.f32 %v1843_v11, 0.0 }
 0x49d   : > { %v1875_v17 = vmax.f32 %v1835_v13, 0.0 }
 0x49e   : > { %v1893_v18 = vpack.c.bf16 %v1877_v15, %v1876_v14 }
 0x49f   : > { %v1892_v19 = vpack.c.bf16 %v1875_v17, %v1874_v16 }
 0x4a1   : > { %2700 = vmatprep.mubr.bf16.mxu1 %v1892_v19 }
 0x4a2   : > { %2701 = vmatmul.mubr.bf16.gmra.mrb[88].mxu1 %v1893_v18 }
 0x53d   : > { %v2674_v33 = vpop.f32.mrb[96].mxu0 }
 0x53e   : > { %v2008_v21 = vadd.f32 %v2674_v33, %v3246_v20  ;;  %v1999_v22 = vpop.f32.mrb[97].mxu0 }
 0x53f   : > { %v2000_v23 = vadd.f32 %v3246_v20, %v1999_v22  ;;  %v2675_v24 = vpop.f32.mrb[98].mxu0 }
 0x540   : > { %2129 = vst.msk [vmem:[%s3253_s14 + $0x10] sm:$0xff] %vm2126_vm1, %v2008_v21  ;;  %v2011_v25 = vadd.f32 %v2675_v24, %v3246_v20  ;;  %v2002_v26 = vpop.f32.mrb[99].mxu0 }
 0x541   : > { %2127 = vst.msk [vmem:[%s3253_s14] sm:$0xff] %vm2126_vm1, %v2000_v23  ;;  %v2003_v27 = vadd.f32 %v3246_v20, %v2002_v26 }
 0x542   : > { %2130 = vst.msk [vmem:[%s3253_s14 + $0x18] sm:$0xff] %vm2126_vm1, %v2011_v25 }
 0x543   : > { %2128 = vst.msk [vmem:[%s3253_s14 + $0x8] sm:$0xff] %vm2126_vm1, %v2003_v27 }
 0x545   : > { %v2678_v28 = vpop.f32.mrb[64].mxu1 }
 0x546   : > { %v2024_v29 = vadd.f32 %v2678_v28, %v3246_v20  ;;  %v2015_v30 = vpop.f32.mrb[65].mxu1 }
 0x547   : > { %v2016_v31 = vadd.f32 %v3246_v20, %v2015_v30  ;;  %v2679_v32 = vpop.f32.mrb[66].mxu1 }
 0x548   : > { %2133 = vst.msk [vmem:[%s3253_s14 + $0x30] sm:$0xff] %vm2126_vm1, %v2024_v29  ;;  %v2027_v45 = vadd.f32 %v2679_v32, %v3246_v20  ;;  %v2018_v34 = vpop.f32.mrb[67].mxu1 }
 0x549   : > { %2131 = vst.msk [vmem:[%s3253_s14 + $0x20] sm:$0xff] %vm2126_vm1, %v2016_v31  ;;  %v2019_v35 = vadd.f32 %v3246_v20, %v2018_v34 }
 0x54a   : > { %2134 = vst.msk [vmem:[%s3253_s14 + $0x38] sm:$0xff] %vm2126_vm1, %v2027_v45 }
 0x54b   : > { %2132 = vst.msk [vmem:[%s3253_s14 + $0x28] sm:$0xff] %vm2126_vm1, %v2019_v35 }
 0x54d   : > { %v2682_v36 = vpop.f32.mrb[68].mxu1 }
 0x54e   : > { %v2040_v37 = vadd.f32 %v2682_v36, %v3246_v20  ;;  %v2031_v38 = vpop.f32.mrb[69].mxu1 }
 0x54f   : > { %v2032_v39 = vadd.f32 %v3246_v20, %v2031_v38  ;;  %v2683_v40 = vpop.f32.mrb[70].mxu1 }
 0x550   : > { %2137 = vst.msk [vmem:[%s3253_s14 + $0x50] sm:$0xff] %vm2126_vm1, %v2040_v37  ;;  %v2043_v52 = vadd.f32 %v2683_v40, %v3246_v20  ;;  %v2034_v41 = vpop.f32.mrb[71].mxu1 }
 0x551   : > { %2135 = vst.msk [vmem:[%s3253_s14 + $0x40] sm:$0xff] %vm2126_vm1, %v2032_v39  ;;  %v2035_v42 = vadd.f32 %v3246_v20, %v2034_v41 }
 0x552   : > { %2138 = vst.msk [vmem:[%s3253_s14 + $0x58] sm:$0xff] %vm2126_vm1, %v2043_v52 }
 0x553   : > { %2136 = vst.msk [vmem:[%s3253_s14 + $0x48] sm:$0xff] %vm2126_vm1, %v2035_v42 }
 0x555   : > { %v2686_v43 = vpop.f32.mrb[72].mxu1 }
 0x556   : > { %v2056_v46 = vadd.f32 %v2686_v43, %v3246_v20  ;;  %v2047_v58 = vpop.f32.mrb[73].mxu1 }
 0x557   : > { %v2048_v47 = vadd.f32 %v3246_v20, %v2047_v58  ;;  %v2687_v48 = vpop.f32.mrb[74].mxu1 }
 0x558   : > { %2141 = vst.msk [vmem:[%s3253_s14 + $0x70] sm:$0xff] %vm2126_vm1, %v2056_v46  ;;  %v2059_v49 = vadd.f32 %v2687_v48, %v3246_v20  ;;  %v2050_v50 = vpop.f32.mrb[75].mxu1 }
 0x559   : > { %2139 = vst.msk [vmem:[%s3253_s14 + $0x60] sm:$0xff] %vm2126_vm1, %v2048_v47  ;;  %v2051_v51 = vadd.f32 %v3246_v20, %v2050_v50 }
 0x55a   : > { %2142 = vst.msk [vmem:[%s3253_s14 + $0x78] sm:$0xff] %vm2126_vm1, %v2059_v49 }
 0x55b   : > { %2140 = vst.msk [vmem:[%s3253_s14 + $0x68] sm:$0xff] %vm2126_vm1, %v2051_v51 }
 0x55d   : > { %v2690_v1 = vpop.f32.mrb[76].mxu1 }
 0x55e   : > { %v2072_v44 = vadd.f32 %v2690_v1, %v3246_v20  ;;  %v2063_v53 = vpop.f32.mrb[77].mxu1 }
 0x55f   : > { %v2064_v54 = vadd.f32 %v3246_v20, %v2063_v53  ;;  %v2691_v55 = vpop.f32.mrb[78].mxu1 }
 0x560   : > { %2145 = vst.msk [vmem:[%s3253_s14 + $0x90] sm:$0xff] %vm2126_vm1, %v2072_v44  ;;  %v2075_v56 = vadd.f32 %v2691_v55, %v3246_v20  ;;  %v2066_v57 = vpop.f32.mrb[79].mxu1 }
 0x561   : > { %2143 = vst.msk [vmem:[%s3253_s14 + $0x80] sm:$0xff] %vm2126_vm1, %v2064_v54  ;;  %v2067_v59 = vadd.f32 %v3246_v20, %v2066_v57 }
 0x562   : > { %2146 = vst.msk [vmem:[%s3253_s14 + $0x98] sm:$0xff] %vm2126_vm1, %v2075_v56 }
 0x563   : > { %2144 = vst.msk [vmem:[%s3253_s14 + $0x88] sm:$0xff] %vm2126_vm1, %v2067_v59 }
 0x565   : > { %v2694_v60 = vpop.f32.mrb[80].mxu1 }
 0x566   : > { %v2088_v61 = vadd.f32 %v2694_v60, %v3246_v20  ;;  %v2079_v62 = vpop.f32.mrb[81].mxu1 }
 0x567   : > { %v2080_v63 = vadd.f32 %v3246_v20, %v2079_v62  ;;  %v2695_v0 = vpop.f32.mrb[82].mxu1 }
 0x568   : > { %2149 = vst.msk [vmem:[%s3253_s14 + $0xb0] sm:$0xff] %vm2126_vm1, %v2088_v61  ;;  %v2091_v2 = vadd.f32 %v2695_v0, %v3246_v20  ;;  %v2082_v3 = vpop.f32.mrb[83].mxu1 }
 0x569   : > { %2147 = vst.msk [vmem:[%s3253_s14 + $0xa0] sm:$0xff] %vm2126_vm1, %v2080_v63  ;;  %v2083_v4 = vadd.f32 %v3246_v20, %v2082_v3 }
 0x56a   : > { %2150 = vst.msk [vmem:[%s3253_s14 + $0xb8] sm:$0xff] %vm2126_vm1, %v2091_v2 }
 0x56b   : > { %2148 = vst.msk [vmem:[%s3253_s14 + $0xa8] sm:$0xff] %vm2126_vm1, %v2083_v4 }
 0x56d   : > { %v2698_v5 = vpop.f32.mrb[84].mxu1 }
 0x56e   : > { %v2104_v6 = vadd.f32 %v2698_v5, %v3246_v20  ;;  %v2095_v7 = vpop.f32.mrb[85].mxu1 }
 0x56f   : > { %v2096_v8 = vadd.f32 %v3246_v20, %v2095_v7  ;;  %v2699_v9 = vpop.f32.mrb[86].mxu1 }
 0x570   : > { %2153 = vst.msk [vmem:[%s3253_s14 + $0xd0] sm:$0xff] %vm2126_vm1, %v2104_v6  ;;  %v2107_v10 = vadd.f32 %v2699_v9, %v3246_v20  ;;  %v2098_v11 = vpop.f32.mrb[87].mxu1 }
 0x571   : > { %2151 = vst.msk [vmem:[%s3253_s14 + $0xc0] sm:$0xff] %vm2126_vm1, %v2096_v8  ;;  %v2099_v12 = vadd.f32 %v3246_v20, %v2098_v11 }
 0x572   : > { %2154 = vst.msk [vmem:[%s3253_s14 + $0xd8] sm:$0xff] %vm2126_vm1, %v2107_v10 }
 0x573   : > { %2152 = vst.msk [vmem:[%s3253_s14 + $0xc8] sm:$0xff] %vm2126_vm1, %v2099_v12 }
 0x575   : > { %v2702_v13 = vpop.f32.mrb[88].mxu1 }
 0x576   : > { %v2120_v14 = vadd.f32 %v2702_v13, %v3246_v20  ;;  %v2111_v15 = vpop.f32.mrb[89].mxu1 }
 0x577   : > { %v2112_v16 = vadd.f32 %v3246_v20, %v2111_v15  ;;  %v2703_v17 = vpop.f32.mrb[90].mxu1 }
 0x578   : > { %2157 = vst.msk [vmem:[%s3253_s14 + $0xf0] sm:$0xff] %vm2126_vm1, %v2120_v14  ;;  %v2123_v18 = vadd.f32 %v2703_v17, %v3246_v20  ;;  %v2114_v19 = vpop.f32.mrb[91].mxu1 }
 0x579   : > { %2155 = vst.msk [vmem:[%s3253_s14 + $0xe0] sm:$0xff] %vm2126_vm1, %v2112_v16  ;;  %v2115_v33 = vadd.f32 %v3246_v20, %v2114_v19 }
 0x57a   : > { %2158 = vst.msk [vmem:[%s3253_s14 + $0xf8] sm:$0xff] %vm2126_vm1, %v2123_v18 }
 0x57b   : > { %2156 = vst.msk [vmem:[%s3253_s14 + $0xe8] sm:$0xff] %vm2126_vm1, %v2115_v33 }
 0x57c PF: > { %s23_s25 = sadd.s32 1, %s2776_s25  }
 0x57d   : > { %p20_p4 = scmp.ge.s32.totalorder %s23_s25, 4  }
 0x57f   :  { %22 = sbr.rel (!%p20_p4) target bundleno = 1 (0x1), region = 102 }

</bundles_post_ra>
